<compile_context>
chip_gen: v7x
topology: tpu7x:2x2x1
jax: 0.10.0
libtpu: 0.0.40
codegen_flags: <defaults>
</compile_context>

<pallas_src>
import functools

import jax
import jax.numpy as jnp
from jax import lax
from jax.experimental import pallas as pl
from jax.experimental.pallas import tpu as pltpu


def _round_up(x, m):
    return (x + m - 1) // m * m


def _pick_vmem_limit():
    # Generation-dependent scoped-VMEM limit: ~3/4 of physical capacity
    # (96 MiB on v5e/v6e with 128 MiB, 48 MiB on v7x with 64 MiB).
    try:
        cap = int(pltpu.get_tpu_info().vmem_capacity_bytes)
        if cap <= 0:
            raise ValueError
        return max(32 << 20, min((cap * 3) // 4, 100 << 20))
    except Exception:
        return 48 << 20          # conservative fallback, fits every generation


VMEM_LIMIT = _pick_vmem_limit()


# ---------------------------------------------------------------------------
# Pallas kernel #1: M-tiled fused  out = relu(A @ W + b)
#   A: (TILE_M, Kp) bf16 (pipelined per grid step)   W: (Kp, Np) bf16 (resident)
#   b: (1, Np) f32                                   out: (TILE_M, Np)
# Np is a multiple of 128 -> lane-dense (unmasked) stores.
# ---------------------------------------------------------------------------
def _linear_kernel(a_ref, w_ref, b_ref, o_ref, *, relu):
    acc = jnp.dot(a_ref[...], w_ref[...], preferred_element_type=jnp.float32)
    acc = acc + b_ref[...]
    if relu:
        acc = jnp.maximum(acc, 0.0)
    o_ref[...] = acc.astype(o_ref.dtype)


def pallas_linear_tiled(a, w, b, *, relu, out_dtype, tile_m):
    """a: (Mp, Kp) bf16, w: (Kp, Np) bf16, b: (1, Np) f32."""
    Mp, Kp = a.shape
    Kp2, Np = w.shape
    assert Kp == Kp2 and Mp % tile_m == 0, (a.shape, w.shape, tile_m)
    assert Kp % 128 == 0 and Np % 128 == 0, (Kp, Np)
    return pl.pallas_call(
        functools.partial(_linear_kernel, relu=relu),
        out_shape=jax.ShapeDtypeStruct((Mp, Np), out_dtype),
        grid=(Mp // tile_m,),
        in_specs=[
            pl.BlockSpec((tile_m, Kp), lambda i: (i, 0)),   # A tile: pipelined
            pl.BlockSpec((Kp, Np), lambda i: (0, 0)),       # W: resident
            pl.BlockSpec((1, Np), lambda i: (0, 0)),        # bias: resident
        ],
        out_specs=pl.BlockSpec((tile_m, Np), lambda i: (i, 0)),
        compiler_params=pltpu.CompilerParams(
            dimension_semantics=("parallel",),              # megacore sharding
            vmem_limit_bytes=VMEM_LIMIT),
    )(a, w, b)


# ---------------------------------------------------------------------------
# im2col glue (plain JAX): NHWC -> (B*oh*ow, kh*kw*C) patch matrix in bf16.
# Patch flattening order (kh, kw, cin) matches a Keras kernel (kh,kw,cin,cout)
# reshaped to (kh*kw*cin, cout).
# ---------------------------------------------------------------------------
def im2col(x, kh, kw, stride):
    B, H, W, C = x.shape
    oh = (H - kh) // stride + 1
    ow = (W - kw) // stride + 1
    patches = []
    for i in range(kh):
        for j in range(kw):
            patches.append(
                x[:, i:i + stride * oh:stride, j:j + stride * ow:stride, :])
    p = jnp.stack(patches, axis=3)            # (B, oh, ow, kh*kw, C)
    return p.reshape(B * oh * ow, kh * kw * C), oh, ow


def conv2d_pallas(x, w_p, b_p, *, kh, kw, stride, cout, tile_m=512):
    """VALID conv + ReLU.  x: (B,H,W,Cin) bf16; w_p/b_p pre-padded by
    prepare_params: w_p (Kp, Np) bf16, b_p (1, Np) f32."""
    B, _, _, cin = x.shape
    a, oh, ow = im2col(x, kh, kw, stride)          # (M, K) bf16
    # TODO(synk): build the im2col patches per M-tile inside the kernel (manual
    # DMA of the needed input rows) to remove the kh*kw/stride^2 HBM dup.
    M, K = a.shape
    Kp, Np = w_p.shape
    assert K == kh * kw * cin and Kp >= K, (K, Kp)
    tm = min(tile_m, _round_up(M, 16))             # multiple of 16 (bf16 packing)
    Mp = _round_up(M, tm)
    a = jnp.pad(a, ((0, Mp - M), (0, Kp - K)))
    out = pallas_linear_tiled(a, w_p, b_p, relu=True,
                              out_dtype=jnp.bfloat16, tile_m=tm)
    return out[:M, :cout].reshape(B, oh, ow, cout)


# ---------------------------------------------------------------------------
# Pallas kernel #2: fused tail
#   conv3(3x3, relu) -> flatten -> dense1(relu) -> dense2(linear)
# Grid: (batch tiles, q-blocks).  Per step:
#   * conv3 for QB output positions at once (one MXU dot, M = QB*BT),
#   * lane-regroup to (BT, QB*C3) and accumulate the dense1 partial
#     contraction (K = QB*C3) into a VMEM hidden-state scratch,
#   * at the last q-block: bias + relu, dense2, write Q-values.
# All intermediates stay on-chip; VMEM use is independent of batch / P3.
# ---------------------------------------------------------------------------
def _tail_kernel(a3_ref, w3_ref, b3_ref, w1_ref, b1_ref, w2_ref, b2_ref,
                 o_ref, hid_ref, *, qb, bt):
    qi = pl.program_id(1)

    @pl.when(qi == 0)
    def _():
        hid_ref[...] = jnp.zeros_like(hid_ref)

    # conv3 for this q-block: rows are (position-major, batch-minor).
    c3 = jnp.dot(a3_ref[0, 0], w3_ref[...], preferred_element_type=jnp.float32)
    c3 = jnp.maximum(c3 + b3_ref[...], 0.0)

    # Regroup the qb position blocks along lanes -> (bt, qb*C3) so the dense1
    # partial contraction runs with K = qb*C3 instead of C3.
    c3cat = jnp.concatenate(
        [c3[q * bt:(q + 1) * bt, :] for q in range(qb)], axis=1)
    hid_ref[...] += jnp.dot(c3cat.astype(jnp.bfloat16), w1_ref[0],
                            preferred_element_type=jnp.float32)

    @pl.when(qi == pl.num_programs(1) - 1)
    def _():
        h = jnp.maximum(hid_ref[...] + b1_ref[...], 0.0).astype(jnp.bfloat16)
        o_ref[...] = (jnp.dot(h, w2_ref[...], preferred_element_type=jnp.float32)
                      + b2_ref[...])


def fused_tail(h2, w3, b3, w1, b1, w2, b2, *, a_size):
    """h2: conv2 output (B, H2, W2, 64) bf16; weights pre-laid-out by
    prepare_params (w3 (K3p,64), w1 (NQ, QB*64, 512), w2 (512, Np))."""
    B, H2, W2, C2 = h2.shape
    oh3, ow3 = H2 - 2, W2 - 2
    P3, K3 = oh3 * ow3, 9 * C2
    K3p, C3 = w3.shape
    NQ, QBC, H1 = w1.shape
    QB = QBC // C3
    P3p = NQ * QB
    Np = w2.shape[1]
    assert QBC == QB * C3 and P3p >= P3, (w1.shape, P3)

    BT = min(64, _round_up(B, 8))        # batch tile (rows per grid step)
    Bp = _round_up(B, BT)
    NB = Bp // BT

    # conv3 im2col built directly in (batch-tile, q-block, q, batch, K) layout.
    # TODO(synk): extract these patches in-kernel from the VMEM-resident conv2
    # output (and fuse conv2 itself) to remove this HBM duplication entirely.
    patches = [h2[:, i:i + oh3, j:j + ow3, :] for i in range(3) for j in range(3)]
    a3 = jnp.stack(patches, axis=3).reshape(B, P3, K3)
    a3 = a3.transpose(1, 0, 2)                                # position-major
    a3 = jnp.pad(a3, ((0, P3p - P3), (0, Bp - B), (0, K3p - K3)))
    a3 = a3.reshape(NQ, QB, NB, BT, K3p).transpose(2, 0, 1, 3, 4)
    a3 = a3.reshape(NB, NQ, QB * BT, K3p)

    out = pl.pallas_call(
        functools.partial(_tail_kernel, qb=QB, bt=BT),
        out_shape=jax.ShapeDtypeStruct((Bp, Np), jnp.float32),
        grid=(NB, NQ),
        in_specs=[
            pl.BlockSpec((1, 1, QB * BT, K3p), lambda bi, qi: (bi, qi, 0, 0)),
            pl.BlockSpec((K3p, C3), lambda bi, qi: (0, 0)),      # w3 resident
            pl.BlockSpec((1, C3), lambda bi, qi: (0, 0)),        # b3 resident
            pl.BlockSpec((1, QB * C3, H1), lambda bi, qi: (qi, 0, 0)),  # w1 blk
            pl.BlockSpec((1, H1), lambda bi, qi: (0, 0)),        # b1 resident
            pl.BlockSpec((H1, Np), lambda bi, qi: (0, 0)),       # w2 resident
            pl.BlockSpec((1, Np), lambda bi, qi: (0, 0)),        # b2 resident
        ],
        out_specs=pl.BlockSpec((BT, Np), lambda bi, qi: (bi, 0)),
        scratch_shapes=[pltpu.VMEM((BT, H1), jnp.float32)],      # hidden acc
        compiler_params=pltpu.CompilerParams(
            dimension_semantics=("parallel", "arbitrary"),
            vmem_limit_bytes=VMEM_LIMIT),
    )(a3, w3, b3, w1, b1, w2, b2)
    # Padded batch rows hold relu(bias) garbage -- sliced off here; do NOT
    # reuse them.
    return out[:B, :a_size]


# ---------------------------------------------------------------------------
# DQN_agent model: parameters + one-time kernel-layout prep + forward
# ---------------------------------------------------------------------------
def init_params(key, action_size):
    ks = jax.random.split(key, 5)
    scale = 0.05

    def w(k, shape):
        return (jax.random.normal(k, shape, jnp.float32) * scale).astype(
            jnp.bfloat16)

    return {
        "c1_w": w(ks[0], (8, 8, 4, 32)),  "c1_b": jnp.zeros((32,), jnp.float32),
        "c2_w": w(ks[1], (4, 4, 32, 64)), "c2_b": jnp.zeros((64,), jnp.float32),
        "c3_w": w(ks[2], (3, 3, 64, 64)), "c3_b": jnp.zeros((64,), jnp.float32),
        # flatten(3*3*64 = 576) -> 512   (shape tied to the 32x32 demo input;
        # the module's hard-coded 80x80 input would need (15*15*64=14400, 512))
        "d1_w": w(ks[3], (576, 512)),     "d1_b": jnp.zeros((512,), jnp.float32),
        "d2_w": w(ks[4], (512, action_size)),
        "d2_b": jnp.zeros((action_size,), jnp.float32),
    }


def prepare_params(params, *, q_block=8):
    """One-time weight padding / re-layout (hoisted out of the forward pass)."""
    def pad2(m, kp, np_):
        return jnp.pad(m, ((0, kp - m.shape[0]), (0, np_ - m.shape[1])))

    c1 = params["c1_w"].reshape(8 * 8 * 4, 32)
    c2 = params["c2_w"].reshape(4 * 4 * 32, 64)
    c3 = params["c3_w"].reshape(3 * 3 * 64, 64)
    K1p, K2p, K3p = (_round_up(c1.shape[0], 128), _round_up(c2.shape[0], 128),
                     _round_up(c3.shape[0], 128))

    C3, (d1r, H1) = 64, params["d1_w"].shape
    assert d1r % C3 == 0, d1r
    P3 = d1r // C3
    P3p = _round_up(P3, q_block)
    NQ = P3p // q_block
    d1 = jnp.pad(params["d1_w"], ((0, (P3p - P3) * C3), (0, 0)))
    d1 = d1.reshape(NQ, q_block * C3, H1)          # dense1 rows grouped per q-block

    a = params["d2_w"].shape[1]
    Np = _round_up(a, 128)

    return {
        "c1_w": pad2(c1, K1p, 128),
        "c1_b": jnp.pad(params["c1_b"], (0, 128 - 32)).reshape(1, 128),
        "c2_w": pad2(c2, K2p, 128),
        "c2_b": jnp.pad(params["c2_b"], (0, 128 - 64)).reshape(1, 128),
        "c3_w": jnp.pad(c3, ((0, K3p - c3.shape[0]), (0, 0))),
        "c3_b": params["c3_b"].reshape(1, C3),
        "d1_w": d1,
        "d1_b": params["d1_b"].reshape(1, H1),
        "d2_w": jnp.pad(params["d2_w"], ((0, 0), (0, Np - a))),
        "d2_b": jnp.pad(params["d2_b"], (0, Np - a)).reshape(1, Np),
    }


def dqn_forward(p, x, *, a_size):
    """x: (B, H, W, 4) NHWC float32 -> Q-values (B, a_size) float32.
    `p` is the prepare_params() output."""
    # TODO(synk): replay buffer / epsilon-greedy / target-network sync are
    # host-side training control flow, not part of forward(), so not kernelized.
    x = x.astype(jnp.bfloat16)
    h = conv2d_pallas(x, p["c1_w"], p["c1_b"], kh=8, kw=8, stride=2, cout=32)
    h = conv2d_pallas(h, p["c2_w"], p["c2_b"], kh=4, kw=4, stride=2, cout=64)
    return fused_tail(h, p["c3_w"], p["c3_b"], p["d1_w"], p["d1_b"],
                      p["d2_w"], p["d2_b"], a_size=a_size)


def dqn_reference(params, x):
    """Pure-JAX (XLA) reference with the same bf16/f32 rounding points."""
    def conv(h, w, b, stride):
        y = lax.conv_general_dilated(
            h, w, (stride, stride), "VALID",
            dimension_numbers=("NHWC", "HWIO", "NHWC"),
            preferred_element_type=jnp.float32)
        return jnp.maximum(y + b, 0.0).astype(jnp.bfloat16)

    h = x.astype(jnp.bfloat16)
    h = conv(h, params["c1_w"], params["c1_b"], 2)
    h = conv(h, params["c2_w"], params["c2_b"], 2)
    h = conv(h, params["c3_w"], params["c3_b"], 1)
    h = h.reshape(h.shape[0], -1)
    h = jnp.maximum(
        jnp.dot(h, params["d1_w"], preferred_element_type=jnp.float32)
        + params["d1_b"], 0.0).astype(jnp.bfloat16)
    return (jnp.dot(h, params["d2_w"], preferred_element_type=jnp.float32)
            + params["d2_b"])


if __name__ == "__main__":
    action_size = 18  # Boxing Atari action space size
    batch = 2
    key = jax.random.PRNGKey(0)
    k_param, k_x = jax.random.split(key)

    params = init_params(k_param, action_size)
    prepped = prepare_params(params)                 # weight re-layout: once
    x = jax.random.normal(k_x, (batch, 32, 32, 4), jnp.float32)

    fwd = jax.jit(functools.partial(dqn_forward, a_size=action_size))
    q = jax.block_until_ready(fwd(prepped, x))

    assert q.shape == (batch, action_size), q.shape
    assert bool(jnp.all(jnp.isfinite(q)))

    # correctness check against the pure-JAX reference
    q_ref = jax.block_until_ready(jax.jit(dqn_reference)(params, x))
    err = float(jnp.max(jnp.abs(q - q_ref)))
    tol = 1e-2 + 5e-2 * float(jnp.max(jnp.abs(q_ref)))
    assert err <= tol, (err, tol)

    print("KERNEL_OK")
</pallas_src>

<mosaic_0001>
module attributes {stable_mosaic.version = 11 : i64} {
  func.func @_linear_kernel(%arg0: i32, %arg1: memref<352x256xbf16, #tpu.memory_space<vmem>>, %arg2: memref<256x128xbf16, #tpu.memory_space<vmem>>, %arg3: memref<1x128xf32, #tpu.memory_space<vmem>>, %arg4: memref<352x128xbf16, #tpu.memory_space<vmem>>) attributes {dimension_semantics = [#tpu.dimension_semantics<parallel>], iteration_bounds = array<i64: 1>, scalar_prefetch = 0 : i64, scratch_operands = 0 : i64, tpu.core_type = #tpu.core_type<tc>, window_params = [{transform_indices = @transform_0, window_bounds = array<i64: 352, 256>}, {pipeline_mode = #tpu.pipeline_mode<synchronous>, transform_indices = @transform_1, window_bounds = array<i64: 256, 128>}, {pipeline_mode = #tpu.pipeline_mode<synchronous>, transform_indices = @transform_2, window_bounds = array<i64: 1, 128>}, {transform_indices = @transform_3, window_bounds = array<i64: 352, 128>}]} {
    %c0 = arith.constant 0 : index
    %c0_0 = arith.constant 0 : index
    %0 = vector.load %arg1[%c0, %c0_0] : memref<352x256xbf16, #tpu.memory_space<vmem>>, vector<352x256xbf16>
    %c0_1 = arith.constant 0 : index
    %c0_2 = arith.constant 0 : index
    %1 = vector.load %arg2[%c0_1, %c0_2] : memref<256x128xbf16, #tpu.memory_space<vmem>>, vector<256x128xbf16>
    %cst = arith.constant dense<0.000000e+00> : vector<352x128xf32>
    %2 = tpu.matmul %0, %1, %cst {dimension_numbers = #tpu.dot_dimension_numbers<[1], [0], [0], [1], [0, 0, 1, 1], [], []>} : vector<352x256xbf16>, vector<256x128xbf16>, vector<352x128xf32> -> vector<352x128xf32>
    %c0_3 = arith.constant 0 : index
    %c0_4 = arith.constant 0 : index
    %3 = vector.load %arg3[%c0_3, %c0_4] : memref<1x128xf32, #tpu.memory_space<vmem>>, vector<1x128xf32>
    %4 = vector.broadcast %3 : vector<1x128xf32> to vector<352x128xf32>
    %5 = arith.addf %2, %4 : vector<352x128xf32>
    %cst_5 = arith.constant 0.000000e+00 : f32
    %6 = vector.broadcast %cst_5 : f32 to vector<352x128xf32>
    %7 = arith.maximumf %5, %6 : vector<352x128xf32>
    %8 = arith.truncf %7 : vector<352x128xf32> to vector<352x128xbf16>
    %c0_6 = arith.constant 0 : index
    %c0_7 = arith.constant 0 : index
    %9 = vector.load %arg4[%c0_6, %c0_7] : memref<352x128xbf16, #tpu.memory_space<vmem>>, vector<352x128xbf16>
    tpu.vector_store %arg4[%c0_6, %c0_7], %8 {strides = array<i32>} : memref<352x128xbf16, #tpu.memory_space<vmem>>, vector<352x128xbf16>,
    return
  }
  func.func @transform_0(%arg0: i32) -> (i32, i32) {
    %c0_i32 = arith.constant 0 : i32
    %c0_i32_0 = arith.constant 0 : i32
    return %arg0, %c0_i32 : i32, i32
  }
  func.func @transform_1(%arg0: i32) -> (i32, i32) {
    %c0_i32 = arith.constant 0 : i32
    %c0_i32_0 = arith.constant 0 : i32
    %c0_i32_1 = arith.constant 0 : i32
    return %c0_i32, %c0_i32_0 : i32, i32
  }
  func.func @transform_2(%arg0: i32) -> (i32, i32) {
    %c0_i32 = arith.constant 0 : i32
    %c0_i32_0 = arith.constant 0 : i32
    %c0_i32_1 = arith.constant 0 : i32
    return %c0_i32, %c0_i32_0 : i32, i32
  }
  func.func @transform_3(%arg0: i32) -> (i32, i32) {
    %c0_i32 = arith.constant 0 : i32
    %c0_i32_0 = arith.constant 0 : i32
    return %arg0, %c0_i32 : i32, i32
  }
}

module attributes {stable_mosaic.version = 11 : i64} {
  func.func @_linear_kernel(%arg0: i32, %arg1: memref<64x512xbf16, #tpu.memory_space<vmem>>, %arg2: memref<512x128xbf16, #tpu.memory_space<vmem>>, %arg3: memref<1x128xf32, #tpu.memory_space<vmem>>, %arg4: memref<64x128xbf16, #tpu.memory_space<vmem>>) attributes {dimension_semantics = [#tpu.dimension_semantics<parallel>], iteration_bounds = array<i64: 1>, scalar_prefetch = 0 : i64, scratch_operands = 0 : i64, tpu.core_type = #tpu.core_type<tc>, window_params = [{transform_indices = @transform_0, window_bounds = array<i64: 64, 512>}, {pipeline_mode = #tpu.pipeline_mode<synchronous>, transform_indices = @transform_1, window_bounds = array<i64: 512, 128>}, {pipeline_mode = #tpu.pipeline_mode<synchronous>, transform_indices = @transform_2, window_bounds = array<i64: 1, 128>}, {transform_indices = @transform_3, window_bounds = array<i64: 64, 128>}]} {
    %c0 = arith.constant 0 : index
    %c0_0 = arith.constant 0 : index
    %0 = vector.load %arg1[%c0, %c0_0] : memref<64x512xbf16, #tpu.memory_space<vmem>>, vector<64x512xbf16>
    %c0_1 = arith.constant 0 : index
    %c0_2 = arith.constant 0 : index
    %1 = vector.load %arg2[%c0_1, %c0_2] : memref<512x128xbf16, #tpu.memory_space<vmem>>, vector<512x128xbf16>
    %cst = arith.constant dense<0.000000e+00> : vector<64x128xf32>
    %2 = tpu.matmul %0, %1, %cst {dimension_numbers = #tpu.dot_dimension_numbers<[1], [0], [0], [1], [0, 0, 1, 1], [], []>} : vector<64x512xbf16>, vector<512x128xbf16>, vector<64x128xf32> -> vector<64x128xf32>
    %c0_3 = arith.constant 0 : index
    %c0_4 = arith.constant 0 : index
    %3 = vector.load %arg3[%c0_3, %c0_4] : memref<1x128xf32, #tpu.memory_space<vmem>>, vector<1x128xf32>
    %4 = vector.broadcast %3 : vector<1x128xf32> to vector<64x128xf32>
    %5 = arith.addf %2, %4 : vector<64x128xf32>
    %cst_5 = arith.constant 0.000000e+00 : f32
    %6 = vector.broadcast %cst_5 : f32 to vector<64x128xf32>
    %7 = arith.maximumf %5, %6 : vector<64x128xf32>
    %8 = arith.truncf %7 : vector<64x128xf32> to vector<64x128xbf16>
    %c0_6 = arith.constant 0 : index
    %c0_7 = arith.constant 0 : index
    %9 = vector.load %arg4[%c0_6, %c0_7] : memref<64x128xbf16, #tpu.memory_space<vmem>>, vector<64x128xbf16>
    tpu.vector_store %arg4[%c0_6, %c0_7], %8 {strides = array<i32>} : memref<64x128xbf16, #tpu.memory_space<vmem>>, vector<64x128xbf16>,
    return
  }
  func.func @transform_0(%arg0: i32) -> (i32, i32) {
    %c0_i32 = arith.constant 0 : i32
    %c0_i32_0 = arith.constant 0 : i32
    return %arg0, %c0_i32 : i32, i32
  }
  func.func @transform_1(%arg0: i32) -> (i32, i32) {
    %c0_i32 = arith.constant 0 : i32
    %c0_i32_0 = arith.constant 0 : i32
    %c0_i32_1 = arith.constant 0 : i32
    return %c0_i32, %c0_i32_0 : i32, i32
  }
  func.func @transform_2(%arg0: i32) -> (i32, i32) {
    %c0_i32 = arith.constant 0 : i32
    %c0_i32_0 = arith.constant 0 : i32
    %c0_i32_1 = arith.constant 0 : i32
    return %c0_i32, %c0_i32_0 : i32, i32
  }
  func.func @transform_3(%arg0: i32) -> (i32, i32) {
    %c0_i32 = arith.constant 0 : i32
    %c0_i32_0 = arith.constant 0 : i32
    return %arg0, %c0_i32 : i32, i32
  }
}

module attributes {stable_mosaic.version = 11 : i64} {
  func.func @_tail_kernel(%arg0: i32, %arg1: i32, %arg2: memref<1x1x64x640xbf16, #tpu.memory_space<vmem>>, %arg3: memref<640x64xbf16, #tpu.memory_space<vmem>>, %arg4: memref<1x64xf32, #tpu.memory_space<vmem>>, %arg5: memref<1x512x512xbf16, #tpu.memory_space<vmem>>, %arg6: memref<1x512xf32, #tpu.memory_space<vmem>>, %arg7: memref<512x128xbf16, #tpu.memory_space<vmem>>, %arg8: memref<1x128xf32, #tpu.memory_space<vmem>>, %arg9: memref<8x128xf32, #tpu.memory_space<vmem>>, %arg10: memref<8x512xf32, #tpu.memory_space<vmem>>) attributes {dimension_semantics = [#tpu.dimension_semantics<parallel>, #tpu.dimension_semantics<arbitrary>], iteration_bounds = array<i64: 1, 2>, scalar_prefetch = 0 : i64, scratch_operands = 1 : i64, tpu.core_type = #tpu.core_type<tc>, window_params = [{transform_indices = @transform_0, window_bounds = array<i64: 1, 1, 64, 640>}, {pipeline_mode = #tpu.pipeline_mode<synchronous>, transform_indices = @transform_1, window_bounds = array<i64: 640, 64>}, {pipeline_mode = #tpu.pipeline_mode<synchronous>, transform_indices = @transform_2, window_bounds = array<i64: 1, 64>}, {transform_indices = @transform_3, window_bounds = array<i64: 1, 512, 512>}, {pipeline_mode = #tpu.pipeline_mode<synchronous>, transform_indices = @transform_4, window_bounds = array<i64: 1, 512>}, {pipeline_mode = #tpu.pipeline_mode<synchronous>, transform_indices = @transform_5, window_bounds = array<i64: 512, 128>}, {pipeline_mode = #tpu.pipeline_mode<synchronous>, transform_indices = @transform_6, window_bounds = array<i64: 1, 128>}, {transform_indices = @transform_7, window_bounds = array<i64: 8, 128>}]} {
    %c0_i32 = arith.constant 0 : i32
    %0 = arith.cmpi eq, %arg1, %c0_i32 : i32
    %1 = arith.extui %0 : i1 to i32
    %c0_i32_0 = arith.constant 0 : i32
    %2 = arith.cmpi ne, %1, %c0_i32_0 : i32
    scf.if %2 {
      %cst_18 = arith.constant 0.000000e+00 : f32
      %31 = vector.broadcast %cst_18 : f32 to vector<8x512xf32>
      %c0_19 = arith.constant 0 : index
      %c0_20 = arith.constant 0 : index
      %32 = vector.load %arg10[%c0_19, %c0_20] : memref<8x512xf32, #tpu.memory_space<vmem>>, vector<8x512xf32>
      tpu.vector_store %arg10[%c0_19, %c0_20], %31 {strides = array<i32>} : memref<8x512xf32, #tpu.memory_space<vmem>>, vector<8x512xf32>,
    } else {
    }
    %c0 = arith.constant 0 : index
    %c0_1 = arith.constant 0 : index
    %c0_2 = arith.constant 0 : index
    %c0_3 = arith.constant 0 : index
    %3 = vector.load %arg2[%c0, %c0_1, %c0_2, %c0_3] : memref<1x1x64x640xbf16, #tpu.memory_space<vmem>>, vector<1x1x64x640xbf16>
    %4 = vector.shape_cast %3 : vector<1x1x64x640xbf16> to vector<64x640xbf16>
    %c0_4 = arith.constant 0 : index
    %c0_5 = arith.constant 0 : index
    %5 = vector.load %arg3[%c0_4, %c0_5] : memref<640x64xbf16, #tpu.memory_space<vmem>>, vector<640x64xbf16>
    %cst = arith.constant dense<0.000000e+00> : vector<64x64xf32>
    %6 = tpu.matmul %4, %5, %cst {dimension_numbers = #tpu.dot_dimension_numbers<[1], [0], [0], [1], [0, 0, 1, 1], [], []>} : vector<64x640xbf16>, vector<640x64xbf16>, vector<64x64xf32> -> vector<64x64xf32>
    %c0_6 = arith.constant 0 : index
    %c0_7 = arith.constant 0 : index
    %7 = vector.load %arg4[%c0_6, %c0_7] : memref<1x64xf32, #tpu.memory_space<vmem>>, vector<1x64xf32>
    %8 = vector.broadcast %7 : vector<1x64xf32> to vector<64x64xf32>
    %9 = arith.addf %6, %8 : vector<64x64xf32>
    %cst_8 = arith.constant 0.000000e+00 : f32
    %10 = vector.broadcast %cst_8 : f32 to vector<64x64xf32>
    %11 = arith.maximumf %9, %10 : vector<64x64xf32>
    %12 = vector.extract_strided_slice %11 {offsets = [0, 0], sizes = [8, 64], strides = [1, 1]} : vector<64x64xf32> to vector<8x64xf32>
    %13 = vector.extract_strided_slice %11 {offsets = [8, 0], sizes = [8, 64], strides = [1, 1]} : vector<64x64xf32> to vector<8x64xf32>
    %14 = vector.extract_strided_slice %11 {offsets = [16, 0], sizes = [8, 64], strides = [1, 1]} : vector<64x64xf32> to vector<8x64xf32>
    %15 = vector.extract_strided_slice %11 {offsets = [24, 0], sizes = [8, 64], strides = [1, 1]} : vector<64x64xf32> to vector<8x64xf32>
    %16 = vector.extract_strided_slice %11 {offsets = [32, 0], sizes = [8, 64], strides = [1, 1]} : vector<64x64xf32> to vector<8x64xf32>
    %17 = vector.extract_strided_slice %11 {offsets = [40, 0], sizes = [8, 64], strides = [1, 1]} : vector<64x64xf32> to vector<8x64xf32>
    %18 = vector.extract_strided_slice %11 {offsets = [48, 0], sizes = [8, 64], strides = [1, 1]} : vector<64x64xf32> to vector<8x64xf32>
    %19 = vector.extract_strided_slice %11 {offsets = [56, 0], sizes = [8, 64], strides = [1, 1]} : vector<64x64xf32> to vector<8x64xf32>
    %20 = tpu.concatenate %12, %13, %14, %15, %16, %17, %18, %19 in 1 : vector<8x64xf32>, vector<8x64xf32>, vector<8x64xf32>, vector<8x64xf32>, vector<8x64xf32>, vector<8x64xf32>, vector<8x64xf32>, vector<8x64xf32> -> vector<8x512xf32>
    %c0_9 = arith.constant 0 : index
    %c0_10 = arith.constant 0 : index
    %21 = vector.load %arg10[%c0_9, %c0_10] : memref<8x512xf32, #tpu.memory_space<vmem>>, vector<8x512xf32>
    %22 = arith.truncf %20 : vector<8x512xf32> to vector<8x512xbf16>
    %c0_11 = arith.constant 0 : index
    %c0_12 = arith.constant 0 : index
    %c0_13 = arith.constant 0 : index
    %23 = vector.load %arg5[%c0_11, %c0_12, %c0_13] : memref<1x512x512xbf16, #tpu.memory_space<vmem>>, vector<1x512x512xbf16>
    %24 = vector.shape_cast %23 : vector<1x512x512xbf16> to vector<512x512xbf16>
    %cst_14 = arith.constant dense<0.000000e+00> : vector<8x512xf32>
    %25 = tpu.matmul %22, %24, %cst_14 {dimension_numbers = #tpu.dot_dimension_numbers<[1], [0], [0], [1], [0, 0, 1, 1], [], []>} : vector<8x512xbf16>, vector<512x512xbf16>, vector<8x512xf32> -> vector<8x512xf32>
    %26 = arith.addf %21, %25 : vector<8x512xf32>
    %c0_15 = arith.constant 0 : index
    %c0_16 = arith.constant 0 : index
    %27 = vector.load %arg10[%c0_15, %c0_16] : memref<8x512xf32, #tpu.memory_space<vmem>>, vector<8x512xf32>
    tpu.vector_store %arg10[%c0_15, %c0_16], %26 {strides = array<i32>} : memref<8x512xf32, #tpu.memory_space<vmem>>, vector<8x512xf32>,
    %c1_i32 = arith.constant 1 : i32
    %28 = arith.cmpi eq, %arg1, %c1_i32 : i32
    %29 = arith.extui %28 : i1 to i32
    %c0_i32_17 = arith.constant 0 : i32
    %30 = arith.cmpi ne, %29, %c0_i32_17 : i32
    scf.if %30 {
      %c0_18 = arith.constant 0 : index
      %c0_19 = arith.constant 0 : index
      %31 = vector.load %arg10[%c0_18, %c0_19] : memref<8x512xf32, #tpu.memory_space<vmem>>, vector<8x512xf32>
      %c0_20 = arith.constant 0 : index
      %c0_21 = arith.constant 0 : index
      %32 = vector.load %arg6[%c0_20, %c0_21] : memref<1x512xf32, #tpu.memory_space<vmem>>, vector<1x512xf32>
      %33 = vector.broadcast %32 : vector<1x512xf32> to vector<8x512xf32>
      %34 = arith.addf %31, %33 : vector<8x512xf32>
      %cst_22 = arith.constant 0.000000e+00 : f32
      %35 = vector.broadcast %cst_22 : f32 to vector<8x512xf32>
      %36 = arith.maximumf %34, %35 : vector<8x512xf32>
      %37 = arith.truncf %36 : vector<8x512xf32> to vector<8x512xbf16>
      %c0_23 = arith.constant 0 : index
      %c0_24 = arith.constant 0 : index
      %38 = vector.load %arg7[%c0_23, %c0_24] : memref<512x128xbf16, #tpu.memory_space<vmem>>, vector<512x128xbf16>
      %cst_25 = arith.constant dense<0.000000e+00> : vector<8x128xf32>
      %39 = tpu.matmul %37, %38, %cst_25 {dimension_numbers = #tpu.dot_dimension_numbers<[1], [0], [0], [1], [0, 0, 1, 1], [], []>} : vector<8x512xbf16>, vector<512x128xbf16>, vector<8x128xf32> -> vector<8x128xf32>
      %c0_26 = arith.constant 0 : index
      %c0_27 = arith.constant 0 : index
      %40 = vector.load %arg8[%c0_26, %c0_27] : memref<1x128xf32, #tpu.memory_space<vmem>>, vector<1x128xf32>
      %41 = vector.broadcast %40 : vector<1x128xf32> to vector<8x128xf32>
      %42 = arith.addf %39, %41 : vector<8x128xf32>
      %c0_28 = arith.constant 0 : index
      %c0_29 = arith.constant 0 : index
      %43 = vector.load %arg9[%c0_28, %c0_29] : memref<8x128xf32, #tpu.memory_space<vmem>>, vector<8x128xf32>
      tpu.vector_store %arg9[%c0_28, %c0_29], %42 {strides = array<i32>} : memref<8x128xf32, #tpu.memory_space<vmem>>, vector<8x128xf32>,
    } else {
    }
    return
  }
  func.func @transform_0(%arg0: i32, %arg1: i32) -> (i32, i32, i32, i32) {
    %c0_i32 = arith.constant 0 : i32
    %c0_i32_0 = arith.constant 0 : i32
    %c0_i32_1 = arith.constant 0 : i32
    return %arg0, %arg1, %c0_i32, %c0_i32_0 : i32, i32, i32, i32
  }
  func.func @transform_1(%arg0: i32, %arg1: i32) -> (i32, i32) {
    %c0_i32 = arith.constant 0 : i32
    %c0_i32_0 = arith.constant 0 : i32
    %c0_i32_1 = arith.constant 0 : i32
    return %c0_i32, %c0_i32_0 : i32, i32
  }
  func.func @transform_2(%arg0: i32, %arg1: i32) -> (i32, i32) {
    %c0_i32 = arith.constant 0 : i32
    %c0_i32_0 = arith.constant 0 : i32
    %c0_i32_1 = arith.constant 0 : i32
    return %c0_i32, %c0_i32_0 : i32, i32
  }
  func.func @transform_3(%arg0: i32, %arg1: i32) -> (i32, i32, i32) {
    %c0_i32 = arith.constant 0 : i32
    %c0_i32_0 = arith.constant 0 : i32
    %c0_i32_1 = arith.constant 0 : i32
    return %arg1, %c0_i32, %c0_i32_0 : i32, i32, i32
  }
  func.func @transform_4(%arg0: i32, %arg1: i32) -> (i32, i32) {
    %c0_i32 = arith.constant 0 : i32
    %c0_i32_0 = arith.constant 0 : i32
    %c0_i32_1 = arith.constant 0 : i32
    return %c0_i32, %c0_i32_0 : i32, i32
  }
  func.func @transform_5(%arg0: i32, %arg1: i32) -> (i32, i32) {
    %c0_i32 = arith.constant 0 : i32
    %c0_i32_0 = arith.constant 0 : i32
    %c0_i32_1 = arith.constant 0 : i32
    return %c0_i32, %c0_i32_0 : i32, i32
  }
  func.func @transform_6(%arg0: i32, %arg1: i32) -> (i32, i32) {
    %c0_i32 = arith.constant 0 : i32
    %c0_i32_0 = arith.constant 0 : i32
    %c0_i32_1 = arith.constant 0 : i32
    return %c0_i32, %c0_i32_0 : i32, i32
  }
  func.func @transform_7(%arg0: i32, %arg1: i32) -> (i32, i32) {
    %c0_i32 = arith.constant 0 : i32
    %c0_i32_0 = arith.constant 0 : i32
    return %arg0, %c0_i32 : i32, i32
  }
}

</mosaic_0001>

<bundles_post_ra>
// kernel: dqn_forward.3
= control target key start
LH: loop header
LB: loop body
LE: loop exit
PB: predicated region body
PF: predicated region fallthrough
CT: control target
= control target key end

     0   :  { %v1286_v0 = vmov 0   ;;  %s1634_s1 = inlined_call_operand.vmem [shape: bf16[256,128], index: 1, kind: input, shape index: {}]   ;;  %s1635_s0 = inlined_call_operand.vmem [shape: bf16[352,256], index: 0, kind: input, shape index: {}]   ;;  %s1636_s2 = inlined_call_operand.vmem [shape: f32[1,128], index: 2, kind: input, shape index: {}]   ;;  %s1637_s3 = inlined_call_operand.vmem [shape: bf16[352,128], index: 3, kind: output, shape index: {}]  }
   0x1   :  { %414 = vmatprep.subr.bf16.mxu0 %v1286_v0  ;;  %1171 = vmatprep.subr.bf16.mxu1 %v1286_v0  ;;  %v1204_v1 = vld [vmem:[%s1634_s1] sm:$0xff]   ;;  %v1205_v2 = vld [vmem:[%s1634_s1 + $0x8] sm:$0xff]   ;;  %v1206_v3 = vld [vmem:[%s1634_s1 + $0x10] sm:$0xff]  }
   0x2   :  { %415 = vmatpush1.bf16.msra.mxu0 %v1204_v1  ;;  %1187 = vmatpush1.bf16.msra.mxu1 %v1204_v1  ;;  %v1207_v4 = vld [vmem:[%s1634_s1 + $0x18] sm:$0xff]   ;;  %v1208_v5 = vld [vmem:[%s1634_s1 + $0x20] sm:$0xff]   ;;  %v1209_v7 = vld [vmem:[%s1634_s1 + $0x28] sm:$0xff]  }
   0x3   :  { %416 = vmatprep.subr.bf16.mxu0 %v1286_v0  ;;  %1172 = vmatprep.subr.bf16.mxu1 %v1286_v0  ;;  %v1222_v6 = vld [vmem:[%s1635_s0 + $0x4] ss:$8 sps:$4 sm:$0xff]   ;;  %v1225_v8 = vld [vmem:[%s1635_s0 + $0xb4] ss:$8 sps:$4 sm:$0xff]   ;;  %v1220_v19 = vld [vmem:[%s1635_s0] ss:$8 sps:$4 sm:$0xff]  }
   0x4   :  { %446 = vmatprep.mubr.bf16.mxu0 %v1222_v6  ;;  %534 = vmatprep.mubr.bf16.mxu1 %v1225_v8  ;;  %v1210_v9 = vld [vmem:[%s1634_s1 + $0x30] sm:$0xff]   ;;  %v1211_v10 = vld [vmem:[%s1634_s1 + $0x38] sm:$0xff]   ;;  %v1212_v11 = vld [vmem:[%s1634_s1 + $0x40] sm:$0xff]  }
   0x5   :  { %v1213_v12 = vld [vmem:[%s1634_s1 + $0x48] sm:$0xff]   ;;  %v1214_v13 = vld [vmem:[%s1634_s1 + $0x50] sm:$0xff]   ;;  %v1215_v14 = vld [vmem:[%s1634_s1 + $0x58] sm:$0xff]  }
   0x6   :  { %417 = vmatpush1.bf16.msra.mxu0 %v1205_v2  ;;  %1188 = vmatpush1.bf16.msra.mxu1 %v1205_v2  ;;  %v1216_v15 = vld [vmem:[%s1634_s1 + $0x60] sm:$0xff]   ;;  %v1217_v16 = vld [vmem:[%s1634_s1 + $0x68] sm:$0xff]   ;;  %v1218_v17 = vld [vmem:[%s1634_s1 + $0x70] sm:$0xff]  }
   0x7   :  { %418 = vmatprep.subr.bf16.mxu0 %v1286_v0  ;;  %1173 = vmatprep.subr.bf16.mxu1 %v1286_v0  ;;  %v1219_v18 = vld [vmem:[%s1634_s1 + $0x78] sm:$0xff]   ;;  %v1228_v22 = vld [vmem:[%s1635_s0 + $0xc4] ss:$8 sps:$4 sm:$0xff]   ;;  %v1231_v24 = vld [vmem:[%s1635_s0 + $0xc0] ss:$8 sps:$4 sm:$0xff]  }
   0x8   :  { %v1223_v20 = vld [vmem:[%s1635_s0 + $0xb0] ss:$8 sps:$4 sm:$0xff]   ;;  %v1226_v21 = vld [vmem:[%s1635_s0 + $0x14] ss:$8 sps:$4 sm:$0xff]   ;;  %v1232_v25 = vld [vmem:[%s1635_s0 + $0x24] ss:$8 sps:$4 sm:$0xff]  }
   0x9   :  { %v1230_v23 = vld [vmem:[%s1635_s0 + $0x10] ss:$8 sps:$4 sm:$0xff]   ;;  %v1234_v26 = vld [vmem:[%s1635_s0 + $0xd4] ss:$8 sps:$4 sm:$0xff]   ;;  %v1236_v27 = vld [vmem:[%s1635_s0 + $0x20] ss:$8 sps:$4 sm:$0xff]  }
   0xa   :  { %419 = vmatpush1.bf16.msra.mxu0 %v1206_v3  ;;  %1189 = vmatpush1.bf16.msra.mxu1 %v1206_v3  ;;  %v1237_v28 = vld [vmem:[%s1635_s0 + $0xd0] ss:$8 sps:$4 sm:$0xff]   ;;  %v1238_v29 = vld [vmem:[%s1635_s0 + $0x34] ss:$8 sps:$4 sm:$0xff]   ;;  %v1240_v30 = vld [vmem:[%s1635_s0 + $0xe4] ss:$8 sps:$4 sm:$0xff]  }
   0xb   :  { %420 = vmatprep.subr.bf16.mxu0 %v1286_v0  ;;  %1174 = vmatprep.subr.bf16.mxu1 %v1286_v0  ;;  %v1242_v31 = vld [vmem:[%s1635_s0 + $0x30] ss:$8 sps:$4 sm:$0xff]   ;;  %v1243_v32 = vld [vmem:[%s1635_s0 + $0xe0] ss:$8 sps:$4 sm:$0xff]   ;;  %v1244_v33 = vld [vmem:[%s1635_s0 + $0x44] ss:$8 sps:$4 sm:$0xff]  }
   0xc   :  { %v1246_v34 = vld [vmem:[%s1635_s0 + $0xf4] ss:$8 sps:$4 sm:$0xff]   ;;  %v1248_v35 = vld [vmem:[%s1635_s0 + $0x40] ss:$8 sps:$4 sm:$0xff]   ;;  %v1249_v36 = vld [vmem:[%s1635_s0 + $0xf0] ss:$8 sps:$4 sm:$0xff]  }
   0xd   :  { %v1250_v37 = vld [vmem:[%s1635_s0 + $0x54] ss:$8 sps:$4 sm:$0xff]   ;;  %v1252_v38 = vld [vmem:[%s1635_s0 + $0x104] ss:$8 sps:$4 sm:$0xff]   ;;  %v1254_v39 = vld [vmem:[%s1635_s0 + $0x50] ss:$8 sps:$4 sm:$0xff]  }
   0xe   :  { %421 = vmatpush1.bf16.msra.mxu0 %v1207_v4  ;;  %1190 = vmatpush1.bf16.msra.mxu1 %v1207_v4  ;;  %v1255_v40 = vld [vmem:[%s1635_s0 + $0x100] ss:$8 sps:$4 sm:$0xff]   ;;  %v1256_v41 = vld [vmem:[%s1635_s0 + $0x64] ss:$8 sps:$4 sm:$0xff]   ;;  %v1258_v42 = vld [vmem:[%s1635_s0 + $0x114] ss:$8 sps:$4 sm:$0xff]  }
   0xf   :  { %422 = vmatprep.subr.bf16.mxu0 %v1286_v0  ;;  %1175 = vmatprep.subr.bf16.mxu1 %v1286_v0  ;;  %v1260_v43 = vld [vmem:[%s1635_s0 + $0x60] ss:$8 sps:$4 sm:$0xff]   ;;  %v1261_v44 = vld [vmem:[%s1635_s0 + $0x110] ss:$8 sps:$4 sm:$0xff]   ;;  %v1262_v45 = vld [vmem:[%s1635_s0 + $0x74] ss:$8 sps:$4 sm:$0xff]  }
  0x10   :  { %v1264_v46 = vld [vmem:[%s1635_s0 + $0x124] ss:$8 sps:$4 sm:$0xff]   ;;  %v1266_v47 = vld [vmem:[%s1635_s0 + $0x70] ss:$8 sps:$4 sm:$0xff]   ;;  %v1267_v48 = vld [vmem:[%s1635_s0 + $0x120] ss:$8 sps:$4 sm:$0xff]  }
  0x11   :  { %v1268_v49 = vld [vmem:[%s1635_s0 + $0x84] ss:$8 sps:$4 sm:$0xff]   ;;  %v1270_v50 = vld [vmem:[%s1635_s0 + $0x134] ss:$8 sps:$4 sm:$0xff]   ;;  %v1272_v51 = vld [vmem:[%s1635_s0 + $0x80] ss:$8 sps:$4 sm:$0xff]  }
  0x12   :  { %423 = vmatpush1.bf16.msra.mxu0 %v1208_v5  ;;  %1191 = vmatpush1.bf16.msra.mxu1 %v1208_v5  ;;  %v1273_v52 = vld [vmem:[%s1635_s0 + $0x130] ss:$8 sps:$4 sm:$0xff]   ;;  %v1274_v53 = vld [vmem:[%s1635_s0 + $0x94] ss:$8 sps:$4 sm:$0xff]   ;;  %v1276_v54 = vld [vmem:[%s1635_s0 + $0x144] ss:$8 sps:$4 sm:$0xff]  }
  0x13   :  { %424 = vmatprep.subr.bf16.mxu0 %v1286_v0  ;;  %1176 = vmatprep.subr.bf16.mxu1 %v1286_v0  ;;  %v1278_v55 = vld [vmem:[%s1635_s0 + $0x90] ss:$8 sps:$4 sm:$0xff]   ;;  %v1279_v56 = vld [vmem:[%s1635_s0 + $0x140] ss:$8 sps:$4 sm:$0xff]   ;;  %v1280_v57 = vld [vmem:[%s1635_s0 + $0xa4] ss:$8 sps:$4 sm:$0xff]  }
  0x14   :  { %v1282_v58 = vld [vmem:[%s1635_s0 + $0x154] ss:$8 sps:$4 sm:$0xff]   ;;  %v1284_v59 = vld [vmem:[%s1635_s0 + $0xa0] ss:$8 sps:$4 sm:$0xff]   ;;  %v1285_v60 = vld [vmem:[%s1635_s0 + $0x150] ss:$8 sps:$4 sm:$0xff]  }
  0x15   :  { %v1522_v61 = vld [vmem:[%s1636_s2] ss:$0 sm:$0xff] }
  0x16   :  { %425 = vmatpush1.bf16.msra.mxu0 %v1209_v7  ;;  %1192 = vmatpush1.bf16.msra.mxu1 %v1209_v7 }
  0x17   :  { %426 = vmatprep.subr.bf16.mxu0 %v1286_v0  ;;  %1177 = vmatprep.subr.bf16.mxu1 %v1286_v0 }
  0x1a   :  { %427 = vmatpush1.bf16.msra.mxu0 %v1210_v9  ;;  %1193 = vmatpush1.bf16.msra.mxu1 %v1210_v9 }
  0x1b   :  { %428 = vmatprep.subr.bf16.mxu0 %v1286_v0  ;;  %1178 = vmatprep.subr.bf16.mxu1 %v1286_v0 }
  0x1e   :  { %429 = vmatpush1.bf16.msra.mxu0 %v1211_v10  ;;  %1194 = vmatpush1.bf16.msra.mxu1 %v1211_v10 }
  0x1f   :  { %430 = vmatprep.subr.bf16.mxu0 %v1286_v0  ;;  %1179 = vmatprep.subr.bf16.mxu1 %v1286_v0 }
  0x22   :  { %431 = vmatpush1.bf16.msra.mxu0 %v1212_v11  ;;  %1195 = vmatpush1.bf16.msra.mxu1 %v1212_v11 }
  0x23   :  { %432 = vmatprep.subr.bf16.mxu0 %v1286_v0  ;;  %1180 = vmatprep.subr.bf16.mxu1 %v1286_v0 }
  0x26   :  { %433 = vmatpush1.bf16.msra.mxu0 %v1213_v12  ;;  %1196 = vmatpush1.bf16.msra.mxu1 %v1213_v12 }
  0x27   :  { %434 = vmatprep.subr.bf16.mxu0 %v1286_v0  ;;  %1181 = vmatprep.subr.bf16.mxu1 %v1286_v0 }
  0x2a   :  { %435 = vmatpush1.bf16.msra.mxu0 %v1214_v13  ;;  %1197 = vmatpush1.bf16.msra.mxu1 %v1214_v13 }
  0x2b   :  { %436 = vmatprep.subr.bf16.mxu0 %v1286_v0  ;;  %1182 = vmatprep.subr.bf16.mxu1 %v1286_v0 }
  0x2e   :  { %437 = vmatpush1.bf16.msra.mxu0 %v1215_v14  ;;  %1198 = vmatpush1.bf16.msra.mxu1 %v1215_v14 }
  0x2f   :  { %438 = vmatprep.subr.bf16.mxu0 %v1286_v0  ;;  %1183 = vmatprep.subr.bf16.mxu1 %v1286_v0 }
  0x32   :  { %439 = vmatpush1.bf16.msra.mxu0 %v1216_v15  ;;  %1199 = vmatpush1.bf16.msra.mxu1 %v1216_v15 }
  0x33   :  { %440 = vmatprep.subr.bf16.mxu0 %v1286_v0  ;;  %1184 = vmatprep.subr.bf16.mxu1 %v1286_v0 }
  0x36   :  { %441 = vmatpush1.bf16.msra.mxu0 %v1217_v16  ;;  %1200 = vmatpush1.bf16.msra.mxu1 %v1217_v16 }
  0x37   :  { %442 = vmatprep.subr.bf16.mxu0 %v1286_v0  ;;  %1185 = vmatprep.subr.bf16.mxu1 %v1286_v0 }
  0x3a   :  { %443 = vmatpush1.bf16.msra.mxu0 %v1218_v17  ;;  %1201 = vmatpush1.bf16.msra.mxu1 %v1218_v17 }
  0x3b   :  { %444 = vmatprep.subr.bf16.mxu0 %v1286_v0  ;;  %1186 = vmatprep.subr.bf16.mxu1 %v1286_v0 }
  0x3e   :  { %445 = vmatpush1.bf16.msra.mxu0 %v1219_v18  ;;  %1202 = vmatpush1.bf16.msra.mxu1 %v1219_v18 }
  0x41   :  { %447 = vmatmul.mubr.bf16.vlgmr.msra.gmra.mrb[0].mxu0 %v1220_v19  ;;  %535 = vmatmul.mubr.bf16.vlgmr.msra.gmra.mrb[0].mxu1 %v1223_v20 }
  0x42   :  { %454 = vmatprep.mubr.bf16.mxu0 %v1226_v21  ;;  %542 = vmatprep.mubr.bf16.mxu1 %v1228_v22 }
  0x49   :  { %455 = vmatmul.mubr.bf16.gmra.mrb[4].mxu0 %v1230_v23  ;;  %543 = vmatmul.mubr.bf16.gmra.mrb[4].mxu1 %v1231_v24 }
  0x4a   :  { %462 = vmatprep.mubr.bf16.mxu0 %v1232_v25  ;;  %550 = vmatprep.mubr.bf16.mxu1 %v1234_v26 }
  0x51   :  { %463 = vmatmul.mubr.bf16.gmra.mrb[8].mxu0 %v1236_v27  ;;  %551 = vmatmul.mubr.bf16.gmra.mrb[8].mxu1 %v1237_v28 }
  0x52   :  { %470 = vmatprep.mubr.bf16.mxu0 %v1238_v29  ;;  %558 = vmatprep.mubr.bf16.mxu1 %v1240_v30 }
  0x59   :  { %471 = vmatmul.mubr.bf16.gmra.mrb[12].mxu0 %v1242_v31  ;;  %559 = vmatmul.mubr.bf16.gmra.mrb[12].mxu1 %v1243_v32 }
  0x5a   :  { %478 = vmatprep.mubr.bf16.mxu0 %v1244_v33  ;;  %566 = vmatprep.mubr.bf16.mxu1 %v1246_v34 }
  0x61   :  { %479 = vmatmul.mubr.bf16.gmra.mrb[16].mxu0 %v1248_v35  ;;  %567 = vmatmul.mubr.bf16.gmra.mrb[16].mxu1 %v1249_v36 }
  0x62   :  { %486 = vmatprep.mubr.bf16.mxu0 %v1250_v37  ;;  %574 = vmatprep.mubr.bf16.mxu1 %v1252_v38 }
  0x69   :  { %487 = vmatmul.mubr.bf16.gmra.mrb[20].mxu0 %v1254_v39  ;;  %575 = vmatmul.mubr.bf16.gmra.mrb[20].mxu1 %v1255_v40 }
  0x6a   :  { %494 = vmatprep.mubr.bf16.mxu0 %v1256_v41  ;;  %582 = vmatprep.mubr.bf16.mxu1 %v1258_v42 }
  0x71   :  { %495 = vmatmul.mubr.bf16.gmra.mrb[24].mxu0 %v1260_v43  ;;  %583 = vmatmul.mubr.bf16.gmra.mrb[24].mxu1 %v1261_v44 }
  0x72   :  { %502 = vmatprep.mubr.bf16.mxu0 %v1262_v45  ;;  %590 = vmatprep.mubr.bf16.mxu1 %v1264_v46 }
  0x79   :  { %503 = vmatmul.mubr.bf16.gmra.mrb[28].mxu0 %v1266_v47  ;;  %591 = vmatmul.mubr.bf16.gmra.mrb[28].mxu1 %v1267_v48 }
  0x7a   :  { %510 = vmatprep.mubr.bf16.mxu0 %v1268_v49  ;;  %598 = vmatprep.mubr.bf16.mxu1 %v1270_v50 }
  0x81   :  { %511 = vmatmul.mubr.bf16.gmra.mrb[32].mxu0 %v1272_v51  ;;  %599 = vmatmul.mubr.bf16.gmra.mrb[32].mxu1 %v1273_v52 }
  0x82   :  { %518 = vmatprep.mubr.bf16.mxu0 %v1274_v53  ;;  %606 = vmatprep.mubr.bf16.mxu1 %v1276_v54 }
  0x89   :  { %519 = vmatmul.mubr.bf16.gmra.mrb[36].mxu0 %v1278_v55  ;;  %607 = vmatmul.mubr.bf16.gmra.mrb[36].mxu1 %v1279_v56 }
  0x8a   :  { %526 = vmatprep.mubr.bf16.mxu0 %v1280_v57  ;;  %614 = vmatprep.mubr.bf16.mxu1 %v1282_v58 }
  0x91   :  { %527 = vmatmul.mubr.bf16.gmra.mrb[40].mxu0 %v1284_v59  ;;  %615 = vmatmul.mubr.bf16.gmra.mrb[40].mxu1 %v1285_v60 }
 0x114   :  { %v448_v62 = vpop.f32.mrb[0].mxu0  ;;  %v536_v63 = vpop.f32.mrb[0].mxu1 }
 0x115   :  { %v449_v0 = vadd.f32 %v1522_v61, %v448_v62  ;;  %v537_v1 = vadd.f32 %v1522_v61, %v536_v63  ;;  %v450_v2 = vpop.f32.mrb[1].mxu0  ;;  %v538_v3 = vpop.f32.mrb[1].mxu1 }
 0x116   :  { %v451_v4 = vpop.f32.mrb[2].mxu0  ;;  %v539_v5 = vpop.f32.mrb[2].mxu1 }
 0x117   :  { %v452_v6 = vadd.f32 %v1522_v61, %v451_v4  ;;  %v540_v7 = vadd.f32 %v1522_v61, %v539_v5  ;;  %v453_v8 = vpop.f32.mrb[3].mxu0  ;;  %v541_v9 = vpop.f32.mrb[3].mxu1  ;;  %v623_v10 = vmax.f32 %v449_v0, 0.0  ;;  %v645_v11 = vmax.f32 %v537_v1, 0.0 }
 0x119   :  { %v624_v12 = vmax.f32 %v452_v6, 0.0  ;;  %v646_v13 = vmax.f32 %v540_v7, 0.0 }
 0x11b   :  { %v1043_v14 = vpack.c.bf16 %v624_v12, %v623_v10  ;;  %v1098_v15 = vpack.c.bf16 %v646_v13, %v645_v11 }
 0x11c   :  { %v456_v16 = vpop.f32.mrb[4].mxu0  ;;  %v544_v17 = vpop.f32.mrb[4].mxu1 }
 0x11d   :  { %1044 = vst [vmem:[%s1637_s3] sm:$0xff] %v1043_v14   ;;  %1160 = vst [vmem:[%s1637_s3 + $0x58] sm:$0xff] %v1098_v15   ;;  %v457_v18 = vadd.f32 %v1522_v61, %v456_v16  ;;  %v545_v19 = vadd.f32 %v1522_v61, %v544_v17  ;;  %v458_v20 = vpop.f32.mrb[5].mxu0  ;;  %v546_v21 = vpop.f32.mrb[5].mxu1 }
 0x11e   :  { %v459_v22 = vpop.f32.mrb[6].mxu0  ;;  %v547_v23 = vpop.f32.mrb[6].mxu1 }
 0x11f   :  { %v460_v24 = vadd.f32 %v1522_v61, %v459_v22  ;;  %v548_v25 = vadd.f32 %v1522_v61, %v547_v23  ;;  %v461_v26 = vpop.f32.mrb[7].mxu0  ;;  %v549_v27 = vpop.f32.mrb[7].mxu1  ;;  %v625_v28 = vmax.f32 %v457_v18, 0.0  ;;  %v647_v29 = vmax.f32 %v545_v19, 0.0 }
 0x121   :  { %v626_v30 = vmax.f32 %v460_v24, 0.0  ;;  %v648_v31 = vmax.f32 %v548_v25, 0.0 }
 0x123   :  { %v1048_v32 = vpack.c.bf16 %v626_v30, %v625_v28  ;;  %v1103_v33 = vpack.c.bf16 %v648_v31, %v647_v29 }
 0x124   :  { %v464_v34 = vpop.f32.mrb[8].mxu0  ;;  %v552_v35 = vpop.f32.mrb[8].mxu1 }
 0x125   :  { %1150 = vst [vmem:[%s1637_s3 + $0x8] sm:$0xff] %v1048_v32   ;;  %1161 = vst [vmem:[%s1637_s3 + $0x60] sm:$0xff] %v1103_v33   ;;  %v465_v36 = vadd.f32 %v1522_v61, %v464_v34  ;;  %v553_v37 = vadd.f32 %v1522_v61, %v552_v35  ;;  %v466_v38 = vpop.f32.mrb[9].mxu0  ;;  %v554_v39 = vpop.f32.mrb[9].mxu1 }
 0x126   :  { %v467_v40 = vpop.f32.mrb[10].mxu0  ;;  %v555_v41 = vpop.f32.mrb[10].mxu1 }
 0x127   :  { %v468_v42 = vadd.f32 %v1522_v61, %v467_v40  ;;  %v556_v43 = vadd.f32 %v1522_v61, %v555_v41  ;;  %v469_v44 = vpop.f32.mrb[11].mxu0  ;;  %v557_v45 = vpop.f32.mrb[11].mxu1  ;;  %v627_v46 = vmax.f32 %v465_v36, 0.0  ;;  %v649_v47 = vmax.f32 %v553_v37, 0.0 }
 0x129   :  { %v628_v48 = vmax.f32 %v468_v42, 0.0  ;;  %v650_v49 = vmax.f32 %v556_v43, 0.0 }
 0x12b   :  { %v1053_v50 = vpack.c.bf16 %v628_v48, %v627_v46  ;;  %v1108_v51 = vpack.c.bf16 %v650_v49, %v649_v47 }
 0x12c   :  { %v472_v52 = vpop.f32.mrb[12].mxu0  ;;  %v560_v53 = vpop.f32.mrb[12].mxu1 }
 0x12d   :  { %1151 = vst [vmem:[%s1637_s3 + $0x10] sm:$0xff] %v1053_v50   ;;  %1162 = vst [vmem:[%s1637_s3 + $0x68] sm:$0xff] %v1108_v51   ;;  %v473_v54 = vadd.f32 %v1522_v61, %v472_v52  ;;  %v561_v55 = vadd.f32 %v1522_v61, %v560_v53  ;;  %v474_v56 = vpop.f32.mrb[13].mxu0  ;;  %v562_v57 = vpop.f32.mrb[13].mxu1 }
 0x12e   :  { %v475_v58 = vpop.f32.mrb[14].mxu0  ;;  %v563_v59 = vpop.f32.mrb[14].mxu1 }
 0x12f   :  { %v476_v60 = vadd.f32 %v1522_v61, %v475_v58  ;;  %v564_v62 = vadd.f32 %v1522_v61, %v563_v59  ;;  %v477_v63 = vpop.f32.mrb[15].mxu0  ;;  %v565_v0 = vpop.f32.mrb[15].mxu1  ;;  %v629_v1 = vmax.f32 %v473_v54, 0.0  ;;  %v651_v2 = vmax.f32 %v561_v55, 0.0 }
 0x131   :  { %v630_v3 = vmax.f32 %v476_v60, 0.0  ;;  %v652_v4 = vmax.f32 %v564_v62, 0.0 }
 0x133   :  { %v1058_v5 = vpack.c.bf16 %v630_v3, %v629_v1  ;;  %v1113_v6 = vpack.c.bf16 %v652_v4, %v651_v2 }
 0x134   :  { %v480_v7 = vpop.f32.mrb[16].mxu0  ;;  %v568_v8 = vpop.f32.mrb[16].mxu1 }
 0x135   :  { %1152 = vst [vmem:[%s1637_s3 + $0x18] sm:$0xff] %v1058_v5   ;;  %1163 = vst [vmem:[%s1637_s3 + $0x70] sm:$0xff] %v1113_v6   ;;  %v481_v9 = vadd.f32 %v1522_v61, %v480_v7  ;;  %v569_v10 = vadd.f32 %v1522_v61, %v568_v8  ;;  %v482_v11 = vpop.f32.mrb[17].mxu0  ;;  %v570_v12 = vpop.f32.mrb[17].mxu1 }
 0x136   :  { %v483_v13 = vpop.f32.mrb[18].mxu0  ;;  %v571_v14 = vpop.f32.mrb[18].mxu1 }
 0x137   :  { %v484_v15 = vadd.f32 %v1522_v61, %v483_v13  ;;  %v572_v16 = vadd.f32 %v1522_v61, %v571_v14  ;;  %v485_v17 = vpop.f32.mrb[19].mxu0  ;;  %v573_v18 = vpop.f32.mrb[19].mxu1  ;;  %v631_v19 = vmax.f32 %v481_v9, 0.0  ;;  %v653_v20 = vmax.f32 %v569_v10, 0.0 }
 0x139   :  { %v632_v21 = vmax.f32 %v484_v15, 0.0  ;;  %v654_v22 = vmax.f32 %v572_v16, 0.0 }
 0x13b   :  { %v1063_v23 = vpack.c.bf16 %v632_v21, %v631_v19  ;;  %v1118_v24 = vpack.c.bf16 %v654_v22, %v653_v20 }
 0x13c   :  { %v488_v25 = vpop.f32.mrb[20].mxu0  ;;  %v576_v26 = vpop.f32.mrb[20].mxu1 }
 0x13d   :  { %1153 = vst [vmem:[%s1637_s3 + $0x20] sm:$0xff] %v1063_v23   ;;  %1164 = vst [vmem:[%s1637_s3 + $0x78] sm:$0xff] %v1118_v24   ;;  %v489_v27 = vadd.f32 %v1522_v61, %v488_v25  ;;  %v577_v28 = vadd.f32 %v1522_v61, %v576_v26  ;;  %v490_v29 = vpop.f32.mrb[21].mxu0  ;;  %v578_v30 = vpop.f32.mrb[21].mxu1 }
 0x13e   :  { %v491_v31 = vpop.f32.mrb[22].mxu0  ;;  %v579_v32 = vpop.f32.mrb[22].mxu1 }
 0x13f   :  { %v492_v33 = vadd.f32 %v1522_v61, %v491_v31  ;;  %v580_v34 = vadd.f32 %v1522_v61, %v579_v32  ;;  %v493_v35 = vpop.f32.mrb[23].mxu0  ;;  %v581_v36 = vpop.f32.mrb[23].mxu1  ;;  %v633_v37 = vmax.f32 %v489_v27, 0.0  ;;  %v655_v38 = vmax.f32 %v577_v28, 0.0 }
 0x141   :  { %v634_v39 = vmax.f32 %v492_v33, 0.0  ;;  %v656_v40 = vmax.f32 %v580_v34, 0.0 }
 0x143   :  { %v1068_v41 = vpack.c.bf16 %v634_v39, %v633_v37  ;;  %v1123_v42 = vpack.c.bf16 %v656_v40, %v655_v38 }
 0x144   :  { %v496_v43 = vpop.f32.mrb[24].mxu0  ;;  %v584_v44 = vpop.f32.mrb[24].mxu1 }
 0x145   :  { %1154 = vst [vmem:[%s1637_s3 + $0x28] sm:$0xff] %v1068_v41   ;;  %1165 = vst [vmem:[%s1637_s3 + $0x80] sm:$0xff] %v1123_v42   ;;  %v497_v45 = vadd.f32 %v1522_v61, %v496_v43  ;;  %v585_v46 = vadd.f32 %v1522_v61, %v584_v44  ;;  %v498_v47 = vpop.f32.mrb[25].mxu0  ;;  %v586_v48 = vpop.f32.mrb[25].mxu1 }
 0x146   :  { %v499_v49 = vpop.f32.mrb[26].mxu0  ;;  %v587_v50 = vpop.f32.mrb[26].mxu1 }
 0x147   :  { %v500_v51 = vadd.f32 %v1522_v61, %v499_v49  ;;  %v588_v52 = vadd.f32 %v1522_v61, %v587_v50  ;;  %v501_v53 = vpop.f32.mrb[27].mxu0  ;;  %v589_v54 = vpop.f32.mrb[27].mxu1  ;;  %v635_v55 = vmax.f32 %v497_v45, 0.0  ;;  %v657_v56 = vmax.f32 %v585_v46, 0.0 }
 0x149   :  { %v636_v57 = vmax.f32 %v500_v51, 0.0  ;;  %v658_v58 = vmax.f32 %v588_v52, 0.0 }
 0x14b   :  { %v1073_v59 = vpack.c.bf16 %v636_v57, %v635_v55  ;;  %v1128_v60 = vpack.c.bf16 %v658_v58, %v657_v56 }
 0x14c   :  { %v504_v62 = vpop.f32.mrb[28].mxu0  ;;  %v592_v63 = vpop.f32.mrb[28].mxu1 }
 0x14d   :  { %1155 = vst [vmem:[%s1637_s3 + $0x30] sm:$0xff] %v1073_v59   ;;  %1166 = vst [vmem:[%s1637_s3 + $0x88] sm:$0xff] %v1128_v60   ;;  %v505_v0 = vadd.f32 %v1522_v61, %v504_v62  ;;  %v593_v1 = vadd.f32 %v1522_v61, %v592_v63  ;;  %v506_v2 = vpop.f32.mrb[29].mxu0  ;;  %v594_v3 = vpop.f32.mrb[29].mxu1 }
 0x14e   :  { %v507_v4 = vpop.f32.mrb[30].mxu0  ;;  %v595_v5 = vpop.f32.mrb[30].mxu1 }
 0x14f   :  { %v508_v6 = vadd.f32 %v1522_v61, %v507_v4  ;;  %v596_v7 = vadd.f32 %v1522_v61, %v595_v5  ;;  %v509_v8 = vpop.f32.mrb[31].mxu0  ;;  %v597_v9 = vpop.f32.mrb[31].mxu1  ;;  %v637_v10 = vmax.f32 %v505_v0, 0.0  ;;  %v659_v11 = vmax.f32 %v593_v1, 0.0 }
 0x151   :  { %v638_v12 = vmax.f32 %v508_v6, 0.0  ;;  %v660_v13 = vmax.f32 %v596_v7, 0.0 }
 0x153   :  { %v1078_v14 = vpack.c.bf16 %v638_v12, %v637_v10  ;;  %v1133_v15 = vpack.c.bf16 %v660_v13, %v659_v11 }
 0x154   :  { %v512_v16 = vpop.f32.mrb[32].mxu0  ;;  %v600_v17 = vpop.f32.mrb[32].mxu1 }
 0x155   :  { %1156 = vst [vmem:[%s1637_s3 + $0x38] sm:$0xff] %v1078_v14   ;;  %1167 = vst [vmem:[%s1637_s3 + $0x90] sm:$0xff] %v1133_v15   ;;  %v513_v18 = vadd.f32 %v1522_v61, %v512_v16  ;;  %v601_v19 = vadd.f32 %v1522_v61, %v600_v17  ;;  %v514_v20 = vpop.f32.mrb[33].mxu0  ;;  %v602_v21 = vpop.f32.mrb[33].mxu1 }
 0x156   :  { %v515_v22 = vpop.f32.mrb[34].mxu0  ;;  %v603_v23 = vpop.f32.mrb[34].mxu1 }
 0x157   :  { %v516_v24 = vadd.f32 %v1522_v61, %v515_v22  ;;  %v604_v25 = vadd.f32 %v1522_v61, %v603_v23  ;;  %v517_v26 = vpop.f32.mrb[35].mxu0  ;;  %v605_v27 = vpop.f32.mrb[35].mxu1  ;;  %v639_v28 = vmax.f32 %v513_v18, 0.0  ;;  %v661_v29 = vmax.f32 %v601_v19, 0.0 }
 0x159   :  { %v640_v30 = vmax.f32 %v516_v24, 0.0  ;;  %v662_v31 = vmax.f32 %v604_v25, 0.0 }
 0x15b   :  { %v1083_v32 = vpack.c.bf16 %v640_v30, %v639_v28  ;;  %v1138_v33 = vpack.c.bf16 %v662_v31, %v661_v29 }
 0x15c   :  { %v520_v34 = vpop.f32.mrb[36].mxu0  ;;  %v608_v35 = vpop.f32.mrb[36].mxu1 }
 0x15d   :  { %1157 = vst [vmem:[%s1637_s3 + $0x40] sm:$0xff] %v1083_v32   ;;  %1168 = vst [vmem:[%s1637_s3 + $0x98] sm:$0xff] %v1138_v33   ;;  %v521_v36 = vadd.f32 %v1522_v61, %v520_v34  ;;  %v609_v37 = vadd.f32 %v1522_v61, %v608_v35  ;;  %v522_v38 = vpop.f32.mrb[37].mxu0  ;;  %v610_v39 = vpop.f32.mrb[37].mxu1 }
 0x15e   :  { %v523_v40 = vpop.f32.mrb[38].mxu0  ;;  %v611_v41 = vpop.f32.mrb[38].mxu1 }
 0x15f   :  { %v524_v42 = vadd.f32 %v1522_v61, %v523_v40  ;;  %v612_v43 = vadd.f32 %v1522_v61, %v611_v41  ;;  %v525_v44 = vpop.f32.mrb[39].mxu0  ;;  %v613_v45 = vpop.f32.mrb[39].mxu1  ;;  %v641_v46 = vmax.f32 %v521_v36, 0.0  ;;  %v663_v47 = vmax.f32 %v609_v37, 0.0 }
 0x161   :  { %v642_v48 = vmax.f32 %v524_v42, 0.0  ;;  %v664_v49 = vmax.f32 %v612_v43, 0.0 }
 0x163   :  { %v1088_v50 = vpack.c.bf16 %v642_v48, %v641_v46  ;;  %v1143_v51 = vpack.c.bf16 %v664_v49, %v663_v47 }
 0x164   :  { %v528_v52 = vpop.f32.mrb[40].mxu0  ;;  %v616_v53 = vpop.f32.mrb[40].mxu1 }
 0x165   :  { %1158 = vst [vmem:[%s1637_s3 + $0x48] sm:$0xff] %v1088_v50   ;;  %1169 = vst [vmem:[%s1637_s3 + $0xa0] sm:$0xff] %v1143_v51   ;;  %v529_v54 = vadd.f32 %v1522_v61, %v528_v52  ;;  %v617_v55 = vadd.f32 %v1522_v61, %v616_v53  ;;  %v530_v56 = vpop.f32.mrb[41].mxu0  ;;  %v618_v57 = vpop.f32.mrb[41].mxu1 }
 0x166   :  { %v531_v58 = vpop.f32.mrb[42].mxu0  ;;  %v619_v59 = vpop.f32.mrb[42].mxu1 }
 0x167   :  { %v532_v60 = vadd.f32 %v1522_v61, %v531_v58  ;;  %v620_v62 = vadd.f32 %v1522_v61, %v619_v59  ;;  %v533_v63 = vpop.f32.mrb[43].mxu0  ;;  %v621_v0 = vpop.f32.mrb[43].mxu1  ;;  %v643_v1 = vmax.f32 %v529_v54, 0.0  ;;  %v665_v2 = vmax.f32 %v617_v55, 0.0 }
 0x169   :  { %v644_v3 = vmax.f32 %v532_v60, 0.0  ;;  %v666_v4 = vmax.f32 %v620_v62, 0.0 }
 0x16b   :  { %v1093_v5 = vpack.c.bf16 %v644_v3, %v643_v1  ;;  %v1148_v6 = vpack.c.bf16 %v666_v4, %v665_v2 }
 0x16d   :  { %1159 = vst [vmem:[%s1637_s3 + $0x50] sm:$0xff] %v1093_v5   ;;  %1170 = vst [vmem:[%s1637_s3 + $0xa8] sm:$0xff] %v1148_v6  }

// kernel: dqn_forward.4
= control target key start
LH: loop header
LB: loop body
LE: loop exit
PB: predicated region body
PF: predicated region fallthrough
CT: control target
= control target key end

     0   :  { %s969_s1 = inlined_call_operand.vmem [shape: bf16[512,128], index: 1, kind: input, shape index: {}]   ;;  %s970_s0 = inlined_call_operand.vmem [shape: bf16[64,512], index: 0, kind: input, shape index: {}]   ;;  %s971_s2 = inlined_call_operand.vmem [shape: f32[1,128], index: 2, kind: input, shape index: {}]   ;;  %s972_s3 = inlined_call_operand.vmem [shape: bf16[64,128], index: 3, kind: output, shape index: {}]  }
   0x1   :  { %v724_v0 = vld [vmem:[%s969_s1 + $0x40] sm:$0xff]   ;;  %v728_v4 = vld [vmem:[%s969_s1 + $0x48] sm:$0xff]   ;;  %v732_v8 = vld [vmem:[%s969_s1 + $0x50] sm:$0xff]  }
   0x2   :  { %v725_v1 = vld [vmem:[%s969_s1 + $0xc0] sm:$0xff]   ;;  %644 = vmatprep.subr.bf16.mxu0 %v724_v0  ;;  %v729_v5 = vld [vmem:[%s969_s1 + $0xc8] sm:$0xff]   ;;  %v733_v9 = vld [vmem:[%s969_s1 + $0xd0] sm:$0xff]  }
   0x3   :  { %v726_v2 = vld [vmem:[%s969_s1] sm:$0xff]   ;;  %684 = vmatprep.subr.bf16.mxu1 %v725_v1  ;;  %v730_v6 = vld [vmem:[%s969_s1 + $0x8] sm:$0xff]   ;;  %v734_v10 = vld [vmem:[%s969_s1 + $0x10] sm:$0xff]  }
   0x4   :  { %v727_v3 = vld [vmem:[%s969_s1 + $0x80] sm:$0xff]   ;;  %645 = vmatpush3.bf16.msra.mxu0 %v726_v2  ;;  %v731_v7 = vld [vmem:[%s969_s1 + $0x88] sm:$0xff]   ;;  %v735_v11 = vld [vmem:[%s969_s1 + $0x90] sm:$0xff]  }
   0x5   :  { %685 = vmatpush3.bf16.msra.mxu1 %v727_v3  ;;  %646 = vmatprep.subr.bf16.mxu0 %v728_v4  ;;  %v736_v12 = vld [vmem:[%s969_s1 + $0x58] sm:$0xff]   ;;  %v740_v16 = vld [vmem:[%s969_s1 + $0x60] sm:$0xff]   ;;  %v744_v20 = vld [vmem:[%s969_s1 + $0x68] sm:$0xff]  }
   0x6   :  { %686 = vmatprep.subr.bf16.mxu1 %v729_v5  ;;  %v737_v13 = vld [vmem:[%s969_s1 + $0xd8] sm:$0xff]   ;;  %v741_v17 = vld [vmem:[%s969_s1 + $0xe0] sm:$0xff]   ;;  %v745_v21 = vld [vmem:[%s969_s1 + $0xe8] sm:$0xff]  }
   0x7   :  { %v738_v14 = vld [vmem:[%s969_s1 + $0x18] sm:$0xff]   ;;  %v742_v18 = vld [vmem:[%s969_s1 + $0x20] sm:$0xff]   ;;  %v746_v22 = vld [vmem:[%s969_s1 + $0x28] sm:$0xff]  }
   0x8   :  { %647 = vmatpush3.bf16.msra.mxu0 %v730_v6  ;;  %v739_v15 = vld [vmem:[%s969_s1 + $0x98] sm:$0xff]   ;;  %v743_v19 = vld [vmem:[%s969_s1 + $0xa0] sm:$0xff]   ;;  %v747_v23 = vld [vmem:[%s969_s1 + $0xa8] sm:$0xff]  }
   0x9   :  { %687 = vmatpush3.bf16.msra.mxu1 %v731_v7  ;;  %648 = vmatprep.subr.bf16.mxu0 %v732_v8  ;;  %v748_v24 = vld [vmem:[%s969_s1 + $0x70] sm:$0xff]   ;;  %v752_v28 = vld [vmem:[%s969_s1 + $0x78] sm:$0xff]   ;;  %v947_v50 = vld [vmem:[%s971_s2] ss:$0 sm:$0xff] }
   0xa   :  { %688 = vmatprep.subr.bf16.mxu1 %v733_v9  ;;  %v749_v25 = vld [vmem:[%s969_s1 + $0xf0] sm:$0xff]   ;;  %v753_v29 = vld [vmem:[%s969_s1 + $0xf8] sm:$0xff]  }
   0xb   :  { %v750_v26 = vld [vmem:[%s969_s1 + $0x30] sm:$0xff]   ;;  %v754_v30 = vld [vmem:[%s969_s1 + $0x38] sm:$0xff]  }
   0xc   :  { %649 = vmatpush3.bf16.msra.mxu0 %v734_v10  ;;  %v751_v27 = vld [vmem:[%s969_s1 + $0xb0] sm:$0xff]   ;;  %v755_v31 = vld [vmem:[%s969_s1 + $0xb8] sm:$0xff]  }
   0xd   :  { %689 = vmatpush3.bf16.msra.mxu1 %v735_v11  ;;  %650 = vmatprep.subr.bf16.mxu0 %v736_v12  ;;  %v756_v32 = vld [vmem:[%s970_s0] ss:$16 sps:$4 sm:$0xff]   ;;  %v758_v33 = vld [vmem:[%s970_s0 + $0x4] ss:$16 sps:$4 sm:$0xff]   ;;  %v759_v34 = vld [vmem:[%s970_s0 + $0x8] ss:$16 sps:$4 sm:$0xff]  }
   0xe   :  { %690 = vmatprep.subr.bf16.mxu1 %v737_v13  ;;  %v761_v35 = vld [vmem:[%s970_s0 + $0xc] ss:$16 sps:$4 sm:$0xff]   ;;  %406 = vmatprep.mubr.bf16.mxu0 %v758_v33  ;;  %v762_v36 = vld [vmem:[%s970_s0 + $0x24] ss:$16 sps:$4 sm:$0xff]   ;;  %v766_v38 = vld [vmem:[%s970_s0 + $0x20] ss:$16 sps:$4 sm:$0xff]  }
   0xf   :  { %471 = vmatprep.mubr.bf16.mxu1 %v761_v35  ;;  %v764_v37 = vld [vmem:[%s970_s0 + $0x2c] ss:$16 sps:$4 sm:$0xff]   ;;  %v767_v39 = vld [vmem:[%s970_s0 + $0x28] ss:$16 sps:$4 sm:$0xff]   ;;  %v768_v40 = vld [vmem:[%s970_s0 + $0x44] ss:$16 sps:$4 sm:$0xff]  }
  0x10   :  { %651 = vmatpush3.bf16.msra.mxu0 %v738_v14  ;;  %v770_v41 = vld [vmem:[%s970_s0 + $0x4c] ss:$16 sps:$4 sm:$0xff]   ;;  %v772_v42 = vld [vmem:[%s970_s0 + $0x40] ss:$16 sps:$4 sm:$0xff]   ;;  %v773_v43 = vld [vmem:[%s970_s0 + $0x48] ss:$16 sps:$4 sm:$0xff]  }
  0x11   :  { %691 = vmatpush3.bf16.msra.mxu1 %v739_v15  ;;  %652 = vmatprep.subr.bf16.mxu0 %v740_v16  ;;  %v774_v44 = vld [vmem:[%s970_s0 + $0x64] ss:$16 sps:$4 sm:$0xff]   ;;  %v776_v45 = vld [vmem:[%s970_s0 + $0x6c] ss:$16 sps:$4 sm:$0xff]   ;;  %v778_v46 = vld [vmem:[%s970_s0 + $0x60] ss:$16 sps:$4 sm:$0xff]  }
  0x12   :  { %692 = vmatprep.subr.bf16.mxu1 %v741_v17  ;;  %v779_v47 = vld [vmem:[%s970_s0 + $0x68] ss:$16 sps:$4 sm:$0xff]  }
  0x14   :  { %653 = vmatpush3.bf16.msra.mxu0 %v742_v18 }
  0x15   :  { %693 = vmatpush3.bf16.msra.mxu1 %v743_v19  ;;  %654 = vmatprep.subr.bf16.mxu0 %v744_v20 }
  0x16   :  { %694 = vmatprep.subr.bf16.mxu1 %v745_v21 }
  0x18   :  { %655 = vmatpush3.bf16.msra.mxu0 %v746_v22 }
  0x19   :  { %695 = vmatpush3.bf16.msra.mxu1 %v747_v23  ;;  %656 = vmatprep.subr.bf16.mxu0 %v748_v24 }
  0x1a   :  { %696 = vmatprep.subr.bf16.mxu1 %v749_v25 }
  0x1c   :  { %657 = vmatpush3.bf16.msra.mxu0 %v750_v26 }
  0x1d   :  { %697 = vmatpush3.bf16.msra.mxu1 %v751_v27  ;;  %658 = vmatprep.subr.bf16.mxu0 %v752_v28 }
  0x1e   :  { %698 = vmatprep.subr.bf16.mxu1 %v753_v29 }
  0x20   :  { %659 = vmatpush3.bf16.msra.mxu0 %v754_v30 }
  0x21   :  { %699 = vmatpush3.bf16.msra.mxu1 %v755_v31 }
  0x23   :  { %407 = vmatmul.mubr.bf16.vlgmr.msra.gmra.mrb[0].mxu0 %v756_v32 }
  0x24   :  { %472 = vmatmul.mubr.bf16.vlgmr.msra.gmra.mrb[0].mxu1 %v759_v34  ;;  %414 = vmatprep.mubr.bf16.mxu0 %v762_v36 }
  0x25   :  { %479 = vmatprep.mubr.bf16.mxu1 %v764_v37 }
  0x2b   :  { %415 = vmatmul.mubr.bf16.gmra.mrb[4].mxu0 %v766_v38 }
  0x2c   :  { %480 = vmatmul.mubr.bf16.gmra.mrb[4].mxu1 %v767_v39  ;;  %422 = vmatprep.mubr.bf16.mxu0 %v768_v40 }
  0x2d   :  { %487 = vmatprep.mubr.bf16.mxu1 %v770_v41 }
  0x33   :  { %423 = vmatmul.mubr.bf16.gmra.mrb[8].mxu0 %v772_v42 }
  0x34   :  { %488 = vmatmul.mubr.bf16.gmra.mrb[8].mxu1 %v773_v43  ;;  %430 = vmatprep.mubr.bf16.mxu0 %v774_v44 }
  0x35   :  { %495 = vmatprep.mubr.bf16.mxu1 %v776_v45 }
  0x3b   :  { %431 = vmatmul.mubr.bf16.gmra.mrb[12].mxu0 %v778_v46 }
  0x3c   :  { %496 = vmatmul.mubr.bf16.gmra.mrb[12].mxu1 %v779_v47 }
  0xf6   :  { %v660_v48 = vpop.f32.mrb[0].mxu0 }
  0xf7   :  { %v700_v49 = vpop.f32.mrb[0].mxu1  ;;  %v661_v51 = vpop.f32.mrb[1].mxu0 }
  0xf8   :  { %v662_v52 = vadd.f32 %v661_v51, %v660_v48  ;;  %v701_v53 = vpop.f32.mrb[1].mxu1  ;;  %v663_v54 = vpop.f32.mrb[2].mxu0 }
  0xf9   :  { %v702_v55 = vadd.f32 %v701_v53, %v700_v49  ;;  %v703_v56 = vpop.f32.mrb[2].mxu1  ;;  %v664_v57 = vpop.f32.mrb[3].mxu0 }
  0xfa   :  { %v409_v58 = vadd.f32 %v662_v52, %v947_v50  ;;  %v665_v59 = vadd.f32 %v664_v57, %v663_v54  ;;  %v704_v60 = vpop.f32.mrb[3].mxu1 }
  0xfb   :  { %v705_v61 = vadd.f32 %v704_v60, %v703_v56 }
  0xfc   :  { %v474_v62 = vadd.f32 %v702_v55, %v409_v58  ;;  %v412_v63 = vadd.f32 %v665_v59, %v947_v50 }
  0xfe   :  { %v477_v0 = vadd.f32 %v705_v61, %v412_v63  ;;  %v666_v1 = vpop.f32.mrb[4].mxu0  ;;  %v504_v4 = vmax.f32 %v474_v62, 0.0 }
  0xff   :  { %v706_v2 = vpop.f32.mrb[4].mxu1  ;;  %v667_v3 = vpop.f32.mrb[5].mxu0 }
 0x100   :  { %v505_v5 = vmax.f32 %v477_v0, 0.0  ;;  %v668_v6 = vadd.f32 %v667_v3, %v666_v1  ;;  %v707_v7 = vpop.f32.mrb[5].mxu1  ;;  %v669_v8 = vpop.f32.mrb[6].mxu0 }
 0x101   :  { %v708_v9 = vadd.f32 %v707_v7, %v706_v2  ;;  %v709_v10 = vpop.f32.mrb[6].mxu1  ;;  %v670_v11 = vpop.f32.mrb[7].mxu0 }
 0x102   :  { %v624_v12 = vpack.c.bf16 %v505_v5, %v504_v4  ;;  %v417_v13 = vadd.f32 %v668_v6, %v947_v50  ;;  %v671_v14 = vadd.f32 %v670_v11, %v669_v8  ;;  %v710_v15 = vpop.f32.mrb[7].mxu1 }
 0x103   :  { %v711_v16 = vadd.f32 %v710_v15, %v709_v10 }
 0x104   :  { %625 = vst [vmem:[%s972_s3] sm:$0xff] %v624_v12   ;;  %v482_v17 = vadd.f32 %v708_v9, %v417_v13  ;;  %v420_v18 = vadd.f32 %v671_v14, %v947_v50 }
 0x106   :  { %v485_v19 = vadd.f32 %v711_v16, %v420_v18  ;;  %v672_v20 = vpop.f32.mrb[8].mxu0  ;;  %v506_v23 = vmax.f32 %v482_v17, 0.0 }
 0x107   :  { %v712_v21 = vpop.f32.mrb[8].mxu1  ;;  %v673_v22 = vpop.f32.mrb[9].mxu0 }
 0x108   :  { %v507_v24 = vmax.f32 %v485_v19, 0.0  ;;  %v674_v25 = vadd.f32 %v673_v22, %v672_v20  ;;  %v713_v26 = vpop.f32.mrb[9].mxu1  ;;  %v675_v27 = vpop.f32.mrb[10].mxu0 }
 0x109   :  { %v714_v28 = vadd.f32 %v713_v26, %v712_v21  ;;  %v715_v29 = vpop.f32.mrb[10].mxu1  ;;  %v676_v30 = vpop.f32.mrb[11].mxu0 }
 0x10a   :  { %v629_v31 = vpack.c.bf16 %v507_v24, %v506_v23  ;;  %v425_v32 = vadd.f32 %v674_v25, %v947_v50  ;;  %v677_v33 = vadd.f32 %v676_v30, %v675_v27  ;;  %v716_v34 = vpop.f32.mrb[11].mxu1 }
 0x10b   :  { %v717_v35 = vadd.f32 %v716_v34, %v715_v29 }
 0x10c   :  { %641 = vst [vmem:[%s972_s3 + $0x8] sm:$0xff] %v629_v31   ;;  %v490_v36 = vadd.f32 %v714_v28, %v425_v32  ;;  %v428_v37 = vadd.f32 %v677_v33, %v947_v50 }
 0x10e   :  { %v493_v38 = vadd.f32 %v717_v35, %v428_v37  ;;  %v678_v39 = vpop.f32.mrb[12].mxu0  ;;  %v508_v42 = vmax.f32 %v490_v36, 0.0 }
 0x10f   :  { %v718_v40 = vpop.f32.mrb[12].mxu1  ;;  %v679_v41 = vpop.f32.mrb[13].mxu0 }
 0x110   :  { %v509_v43 = vmax.f32 %v493_v38, 0.0  ;;  %v680_v44 = vadd.f32 %v679_v41, %v678_v39  ;;  %v719_v45 = vpop.f32.mrb[13].mxu1  ;;  %v681_v46 = vpop.f32.mrb[14].mxu0 }
 0x111   :  { %v720_v47 = vadd.f32 %v719_v45, %v718_v40  ;;  %v721_v48 = vpop.f32.mrb[14].mxu1  ;;  %v682_v49 = vpop.f32.mrb[15].mxu0 }
 0x112   :  { %v634_v51 = vpack.c.bf16 %v509_v43, %v508_v42  ;;  %v433_v52 = vadd.f32 %v680_v44, %v947_v50  ;;  %v683_v53 = vadd.f32 %v682_v49, %v681_v46  ;;  %v722_v54 = vpop.f32.mrb[15].mxu1 }
 0x113   :  { %v723_v55 = vadd.f32 %v722_v54, %v721_v48 }
 0x114   :  { %642 = vst [vmem:[%s972_s3 + $0x10] sm:$0xff] %v634_v51   ;;  %v498_v56 = vadd.f32 %v720_v47, %v433_v52  ;;  %v436_v57 = vadd.f32 %v683_v53, %v947_v50 }
 0x116   :  { %v501_v58 = vadd.f32 %v723_v55, %v436_v57  ;;  %v510_v59 = vmax.f32 %v498_v56, 0.0 }
 0x118   :  { %v511_v60 = vmax.f32 %v501_v58, 0.0 }
 0x11a   :  { %v639_v61 = vpack.c.bf16 %v511_v60, %v510_v59 }
 0x11c   :  { %643 = vst [vmem:[%s972_s3 + $0x18] sm:$0xff] %v639_v61  }

// kernel: dqn_forward.5
= control target key start
LH: loop header
LB: loop body
LE: loop exit
PB: predicated region body
PF: predicated region fallthrough
CT: control target
= control target key end

     0   :  { %s3215_s24 = smov 0   ;;  %s3217_s25 = smov 0   ;;  %s3646_s0 = inlined_call_operand.vmem [shape: bf16[1,2,64,640], index: 0, kind: input, shape index: {}]   ;;  %s3647_s1 = inlined_call_operand.vmem [shape: bf16[640,64], index: 1, kind: input, shape index: {}]   ;;  %s3648_s2 = inlined_call_operand.vmem [shape: f32[1,64], index: 2, kind: input, shape index: {}]   ;;  %s3649_s3 = inlined_call_operand.vmem [shape: bf16[2,512,512], index: 3, kind: input, shape index: {}]   ;;  %s3650_s4 = inlined_call_operand.vmem [shape: f32[1,512], index: 4, kind: input, shape index: {}]   ;;  %s3651_s5 = inlined_call_operand.vmem [shape: bf16[512,128], index: 5, kind: input, shape index: {}]   ;;  %s3652_s6 = inlined_call_operand.vmem [shape: f32[1,128], index: 6, kind: input, shape index: {}]   ;;  %s3653_s7 = inlined_call_operand.vmem [shape: f32[8,128], index: 7, kind: output, shape index: {}]  }
   0x1   :  { %s3219_s26 = smov 0  }
   0x2 LB: > { %s26_s27 = sadd.s32 1, %s3167_s25  ;;  %p2428_p0 = scmp.ge.s32.totalorder %s3171_s26, 1  ;;  %s3171_s26 = sphi %s3219_s26, %s17_s26   ;;  %s3167_s25 = sphi %s3217_s25, %s3655_s25   ;;  %s3163_s24 = sphi %s3215_s24, %s3654_s24  }
   0x3   : > { %p27_p1 = scmp.ge.s32.totalorder %s26_s27, 2  ;;  %p265_p2 = scmp.lt.s32.totalorder %s3171_s26, 3 }
   0x5   : > { %s3657_s27 = smov (%p27_p1, %s26_s27), 0  ;;  %p266_p3 = pnand %p2428_p0, %p265_p2 }
   0x6   : > { %p307_p4 = scmp.lt.s32.totalorder (!%p266_p3), %s3163_s24, 1  ;;  %p2432_p5 = scmp.ne.s32.totalorder (!%p266_p3), %s3163_s24, 0 }
   0x7   : > { %269 = sbr.rel (%p266_p3) target bundleno = 953 (0x3b9), region = 48 }
   0xe   : > { %s308_s28 = scalar_select %p307_p4, %s3163_s24, 1 }
   0xf   : > { %327 = sbr.rel (%p2432_p5) target bundleno = 22 (0x16), region = 52  ;;  %v3173_v0 = vmov (!%p2432_p5), 0.0  }
  0x10   : > { %s2820_s29 = smul.u32 160, %s308_s28  ;;  %s2659_s30 = sshll.u32 %s308_s28, 10  ;;  %328 = vst [vmem:[#allocation2] sm:$0xff] (!%p2432_p5), %v3173_v0  ;;  %329 = vst [vmem:[#allocation2 + $0x8] sm:$0xff] (!%p2432_p5), %v3173_v0 }
  0x11   : > { %s3240_s10 = scalar_lea.vmem %s3649_s3, %s2659_s30  ;;  %330 = vst [vmem:[#allocation2 + $0x10] sm:$0xff] (!%p2432_p5), %v3173_v0  ;;  %331 = vst [vmem:[#allocation2 + $0x18] sm:$0xff] (!%p2432_p5), %v3173_v0 }
  0x12   : > { %s3245_s13 = scalar_lea.vmem %s3646_s0, %s2820_s29 }
  0x16 PF: > { %v2857_v1 = vld [vmem:[%s3647_s1 + $0x40] sm:$0xff]   ;;  %v2861_v5 = vld [vmem:[%s3647_s1 + $0x48] sm:$0xff]   ;;  %v2865_v9 = vld [vmem:[%s3647_s1 + $0x50] sm:$0xff]   ;;  %s3174_s8 = smov 64   ;;  %vm1006_vm0 = vcmask 523264   ;;  %p2622_p6 = scmp.ne.s32.totalorder %s3163_s24, 1 }
  0x17   : > { %v2858_v2 = vld [vmem:[%s3647_s1] sm:$0xff]   ;;  %2660 = vmatprep.subr.bf16.mxu0 %v2857_v1  ;;  %v2862_v6 = vld [vmem:[%s3647_s1 + $0x8] sm:$0xff]   ;;  %v2866_v10 = vld [vmem:[%s3647_s1 + $0x10] sm:$0xff]  }
  0x18   : > { %v2859_v3 = vld [vmem:[%s3647_s1 + $0xc0] sm:$0xff]   ;;  %2661 = vmatpush3.bf16.msra.mxu0 %v2858_v2  ;;  %v2863_v7 = vld [vmem:[%s3647_s1 + $0xc8] sm:$0xff]   ;;  %v2867_v11 = vld [vmem:[%s3647_s1 + $0xd0] sm:$0xff]  }
  0x19   : > { %v2860_v4 = vld [vmem:[%s3647_s1 + $0x80] sm:$0xff]   ;;  %2700 = vmatprep.subr.bf16.mxu1 %v2859_v3  ;;  %2662 = vmatprep.subr.bf16.mxu0 %v2861_v5  ;;  %v2864_v8 = vld [vmem:[%s3647_s1 + $0x88] sm:$0xff]   ;;  %v2868_v12 = vld [vmem:[%s3647_s1 + $0x90] sm:$0xff]  }
  0x1a   : > { %2701 = vmatpush3.bf16.msra.mxu1 %v2860_v4  ;;  %v2869_v13 = vld [vmem:[%s3647_s1 + $0x58] sm:$0xff]   ;;  %v2873_v17 = vld [vmem:[%s3647_s1 + $0x60] sm:$0xff]   ;;  %v2877_v21 = vld [vmem:[%s3647_s1 + $0x68] sm:$0xff]  }
  0x1b   : > { %2702 = vmatprep.subr.bf16.mxu1 %v2863_v7  ;;  %v2870_v14 = vld [vmem:[%s3647_s1 + $0x18] sm:$0xff]   ;;  %v2874_v18 = vld [vmem:[%s3647_s1 + $0x20] sm:$0xff]   ;;  %v2878_v22 = vld [vmem:[%s3647_s1 + $0x28] sm:$0xff]  }
  0x1c   : > { %2663 = vmatpush3.bf16.msra.mxu0 %v2862_v6  ;;  %v2871_v15 = vld [vmem:[%s3647_s1 + $0xd8] sm:$0xff]   ;;  %v2875_v19 = vld [vmem:[%s3647_s1 + $0xe0] sm:$0xff]   ;;  %v2879_v23 = vld [vmem:[%s3647_s1 + $0xe8] sm:$0xff]  }
  0x1d   : > { %2664 = vmatprep.subr.bf16.mxu0 %v2865_v9  ;;  %v2872_v16 = vld [vmem:[%s3647_s1 + $0x98] sm:$0xff]   ;;  %v2876_v20 = vld [vmem:[%s3647_s1 + $0xa0] sm:$0xff]   ;;  %v2880_v24 = vld [vmem:[%s3647_s1 + $0xa8] sm:$0xff]  }
  0x1e   : > { %2703 = vmatpush3.bf16.msra.mxu1 %v2864_v8  ;;  %v2881_v25 = vld [vmem:[%s3647_s1 + $0x70] sm:$0xff]   ;;  %v2885_v29 = vld [vmem:[%s3647_s1 + $0x78] sm:$0xff]   ;;  %v2892_v35 = vld [vmem:[%s3647_s1 + $0x100] sm:$0xff]  }
  0x1f   : > { %2704 = vmatprep.subr.bf16.mxu1 %v2867_v11  ;;  %v2882_v26 = vld [vmem:[%s3647_s1 + $0x30] sm:$0xff]   ;;  %v2886_v30 = vld [vmem:[%s3647_s1 + $0x38] sm:$0xff]   ;;  %v2895_v37 = vld [vmem:[%s3245_s13 + $0xc] ss:$20 sps:$4 sm:$0xff]  }
  0x20   : > { %2665 = vmatpush3.bf16.msra.mxu0 %v2866_v10  ;;  %v2883_v27 = vld [vmem:[%s3647_s1 + $0xf0] sm:$0xff]   ;;  %v2887_v31 = vld [vmem:[%s3647_s1 + $0xf8] sm:$0xff]   ;;  %v2896_v38 = vld [vmem:[%s3647_s1 + $0x108] sm:$0xff]   ;;  %884 = vmatprep.mubr.bf16.mxu1 %v2895_v37 }
  0x21   : > { %2666 = vmatprep.subr.bf16.mxu0 %v2869_v13  ;;  %v2884_v28 = vld [vmem:[%s3647_s1 + $0xb0] sm:$0xff]   ;;  %v2890_v33 = vld [vmem:[%s3245_s13 + $0x4] ss:$20 sps:$4 sm:$0xff]   ;;  %v2893_v36 = vld [vmem:[%s3245_s13 + $0x8] ss:$20 sps:$4 sm:$0xff]  }
  0x22   : > { %2705 = vmatpush3.bf16.msra.mxu1 %v2868_v12  ;;  %v2888_v32 = vld [vmem:[%s3245_s13] ss:$20 sps:$4 sm:$0xff]   ;;  %v2891_v34 = vld [vmem:[%s3647_s1 + $0xb8] sm:$0xff]   ;;  %819 = vmatprep.mubr.bf16.mxu0 %v2890_v33  ;;  %v2903_v43 = vld [vmem:[%s3245_s13 + $0x30] ss:$20 sps:$4 sm:$0xff]  }
  0x23   : > { %2706 = vmatprep.subr.bf16.mxu1 %v2871_v15  ;;  %v2897_v39 = vld [vmem:[%s3245_s13 + $0x2c] ss:$20 sps:$4 sm:$0xff]   ;;  %v2899_v40 = vld [vmem:[%s3245_s13 + $0x28] ss:$20 sps:$4 sm:$0xff]   ;;  %v2900_v41 = vld [vmem:[%s3647_s1 + $0x110] sm:$0xff]  }
  0x24   : > { %2667 = vmatpush3.bf16.msra.mxu0 %v2870_v14  ;;  %v2901_v42 = vld [vmem:[%s3245_s13 + $0x34] ss:$20 sps:$4 sm:$0xff]   ;;  %v2904_v44 = vld [vmem:[%s3647_s1 + $0x118] sm:$0xff]   ;;  %v2908_v47 = vld [vmem:[%s3647_s1 + $0x120] sm:$0xff]  }
  0x25   : > { %2668 = vmatprep.subr.bf16.mxu0 %v2873_v17  ;;  %v2905_v45 = vld [vmem:[%s3245_s13 + $0x54] ss:$20 sps:$4 sm:$0xff]   ;;  %v2909_v46 = vld [vmem:[%s3245_s13 + $0x5c] ss:$20 sps:$4 sm:$0xff]   ;;  %v2911_v50 = vld [vmem:[%s3245_s13 + $0x58] ss:$20 sps:$4 sm:$0xff]  }
  0x26   : > { %2707 = vmatpush3.bf16.msra.mxu1 %v2872_v16  ;;  %v2907_v48 = vld [vmem:[%s3245_s13 + $0x50] ss:$20 sps:$4 sm:$0xff]   ;;  %v2912_v51 = vld [vmem:[%s3647_s1 + $0x128] sm:$0xff]   ;;  %v2919_v56 = vld [vmem:[%s3245_s13 + $0x80] ss:$20 sps:$4 sm:$0xff]  }
  0x27   : > { %2708 = vmatprep.subr.bf16.mxu1 %v2875_v19  ;;  %v2913_v49 = vld [vmem:[%s3245_s13 + $0x7c] ss:$20 sps:$4 sm:$0xff]   ;;  %v2917_v52 = vld [vmem:[%s3245_s13 + $0x84] ss:$20 sps:$4 sm:$0xff]   ;;  %v2923_v59 = vld [vmem:[%s3245_s13 + $0x60] ss:$20 sps:$4 sm:$0xff]  }
  0x28   : > { %2669 = vmatpush3.bf16.msra.mxu0 %v2874_v18  ;;  %v2915_v53 = vld [vmem:[%s3245_s13 + $0x78] ss:$20 sps:$4 sm:$0xff]   ;;  %v2916_v54 = vld [vmem:[%s3647_s1 + $0x130] sm:$0xff]   ;;  %v2924_v60 = vld [vmem:[%s3245_s13 + $0x88] ss:$20 sps:$4 sm:$0xff]  }
  0x29   : > { %2670 = vmatprep.subr.bf16.mxu0 %v2877_v21  ;;  %v2921_v55 = vld [vmem:[%s3245_s13 + $0x10] ss:$20 sps:$4 sm:$0xff]   ;;  %v2920_v57 = vld [vmem:[%s3647_s1 + $0x138] sm:$0xff]  }
  0x2a   : > { %2709 = vmatpush3.bf16.msra.mxu1 %v2876_v20  ;;  %v2922_v58 = vld [vmem:[%s3245_s13 + $0x38] ss:$20 sps:$4 sm:$0xff]   ;;  %v2925_v61 = vld [vmem:[%s3240_s10] ss:$16 sps:$4 sm:$0xff]   ;;  %v2927_v62 = vld [vmem:[%s3240_s10 + $0x4] ss:$16 sps:$4 sm:$0xff]  }
  0x2b   : > { %2710 = vmatprep.subr.bf16.mxu1 %v2879_v23  ;;  %v2928_v63 = vld [vmem:[%s3240_s10 + $0x200] ss:$16 sps:$4 sm:$0xff]   ;;  %v2930_v0 = vld [vmem:[%s3240_s10 + $0x204] ss:$16 sps:$4 sm:$0xff]  }
  0x2c   : > { %2671 = vmatpush3.bf16.msra.mxu0 %v2878_v22  ;;  %v2933_v1 = vld [vmem:[%s3240_s10 + $0x24] ss:$16 sps:$4 sm:$0xff]   ;;  %v2931_v3 = vld [vmem:[%s3240_s10 + $0x20] ss:$16 sps:$4 sm:$0xff]  }
  0x2d   : > { %2672 = vmatprep.subr.bf16.mxu0 %v2881_v25  ;;  %v2936_v2 = vld [vmem:[%s3240_s10 + $0x224] ss:$16 sps:$4 sm:$0xff]   ;;  %v2934_v4 = vld [vmem:[%s3240_s10 + $0x220] ss:$16 sps:$4 sm:$0xff]  }
  0x2e   : > { %2711 = vmatpush3.bf16.msra.mxu1 %v2880_v24  ;;  %v2939_v5 = vld [vmem:[%s3240_s10 + $0x44] ss:$16 sps:$4 sm:$0xff]   ;;  %v2937_v7 = vld [vmem:[%s3240_s10 + $0x40] ss:$16 sps:$4 sm:$0xff]  }
  0x2f   : > { %2712 = vmatprep.subr.bf16.mxu1 %v2883_v27  ;;  %v2942_v6 = vld [vmem:[%s3240_s10 + $0x244] ss:$16 sps:$4 sm:$0xff]   ;;  %v2940_v8 = vld [vmem:[%s3240_s10 + $0x240] ss:$16 sps:$4 sm:$0xff]  }
  0x30   : > { %2673 = vmatpush3.bf16.msra.mxu0 %v2882_v26  ;;  %v2945_v9 = vld [vmem:[%s3240_s10 + $0x64] ss:$16 sps:$4 sm:$0xff]   ;;  %v2943_v11 = vld [vmem:[%s3240_s10 + $0x60] ss:$16 sps:$4 sm:$0xff]  }
  0x31   : > { %2674 = vmatprep.subr.bf16.mxu0 %v2885_v29  ;;  %v2948_v10 = vld [vmem:[%s3240_s10 + $0x264] ss:$16 sps:$4 sm:$0xff]   ;;  %v2946_v12 = vld [vmem:[%s3240_s10 + $0x260] ss:$16 sps:$4 sm:$0xff]  }
  0x32   : > { %2713 = vmatpush3.bf16.msra.mxu1 %v2884_v28  ;;  %v2951_v13 = vld [vmem:[%s3240_s10 + $0x84] ss:$16 sps:$4 sm:$0xff]   ;;  %v2949_v15 = vld [vmem:[%s3240_s10 + $0x80] ss:$16 sps:$4 sm:$0xff]  }
  0x33   : > { %2714 = vmatprep.subr.bf16.mxu1 %v2887_v31  ;;  %v2954_v14 = vld [vmem:[%s3240_s10 + $0x284] ss:$16 sps:$4 sm:$0xff]   ;;  %v2952_v16 = vld [vmem:[%s3240_s10 + $0x280] ss:$16 sps:$4 sm:$0xff]  }
  0x34   : > { %2675 = vmatpush3.bf16.msra.mxu0 %v2886_v30  ;;  %v2957_v17 = vld [vmem:[%s3240_s10 + $0xa4] ss:$16 sps:$4 sm:$0xff]   ;;  %v2955_v19 = vld [vmem:[%s3240_s10 + $0xa0] ss:$16 sps:$4 sm:$0xff]  }
  0x35   : > { %2796 = vmatprep.subr.bf16.mxu0 %v2892_v35  ;;  %v2960_v18 = vld [vmem:[%s3240_s10 + $0x2a4] ss:$16 sps:$4 sm:$0xff]   ;;  %v2958_v20 = vld [vmem:[%s3240_s10 + $0x2a0] ss:$16 sps:$4 sm:$0xff]  }
  0x36   : > { %2715 = vmatpush3.bf16.msra.mxu1 %v2891_v34  ;;  %v2963_v21 = vld [vmem:[%s3240_s10 + $0xc4] ss:$16 sps:$4 sm:$0xff]   ;;  %v2961_v23 = vld [vmem:[%s3240_s10 + $0xc0] ss:$16 sps:$4 sm:$0xff]  }
  0x37   : > { %820 = vmatmul.mubr.bf16.vlgmr.msra.gmra.mrb[0].mxu0 %v2888_v32  ;;  %1787 = vmatprep.subr.bf16.mxu1 %v2927_v62  ;;  %v2966_v22 = vld [vmem:[%s3240_s10 + $0x2c4] ss:$16 sps:$4 sm:$0xff]   ;;  %v2964_v24 = vld [vmem:[%s3240_s10 + $0x2c0] ss:$16 sps:$4 sm:$0xff]  }
  0x38   : > { %2797 = vmatpush3.bf16.msra.mxu0 %v2892_v35  ;;  %827 = vmatprep.mubr.bf16.mxu0 %v2897_v39  ;;  %v2969_v25 = vld [vmem:[%s3240_s10 + $0xe4] ss:$16 sps:$4 sm:$0xff]   ;;  %v2967_v27 = vld [vmem:[%s3240_s10 + $0xe0] ss:$16 sps:$4 sm:$0xff]  }
  0x39   : > { %885 = vmatmul.mubr.bf16.vlgmr.msra.gmra.mrb[0].mxu1 %v2893_v36  ;;  %2798 = vmatprep.subr.bf16.mxu0 %v2896_v38  ;;  %v2972_v26 = vld [vmem:[%s3240_s10 + $0x2e4] ss:$16 sps:$4 sm:$0xff]   ;;  %v2970_v28 = vld [vmem:[%s3240_s10 + $0x2e0] ss:$16 sps:$4 sm:$0xff]  }
  0x3a   : > { %892 = vmatprep.mubr.bf16.mxu1 %v2901_v42  ;;  %1788 = vmatpush1.bf16.msra.mxu1 %v2925_v61  ;;  %v2975_v29 = vld [vmem:[%s3240_s10 + $0x104] ss:$16 sps:$4 sm:$0xff]   ;;  %v2973_v31 = vld [vmem:[%s3240_s10 + $0x100] ss:$16 sps:$4 sm:$0xff]  }
  0x3b   : > { %1789 = vmatprep.subr.bf16.mxu1 %v2933_v1  ;;  %v2978_v30 = vld [vmem:[%s3240_s10 + $0x304] ss:$16 sps:$4 sm:$0xff]   ;;  %v2976_v32 = vld [vmem:[%s3240_s10 + $0x300] ss:$16 sps:$4 sm:$0xff]  }
  0x3c   : > { %2799 = vmatpush3.bf16.msra.mxu0 %v2896_v38  ;;  %v2981_v33 = vld [vmem:[%s3240_s10 + $0x124] ss:$16 sps:$4 sm:$0xff]   ;;  %v2979_v35 = vld [vmem:[%s3240_s10 + $0x120] ss:$16 sps:$4 sm:$0xff]  }
  0x3d   : > { %2800 = vmatprep.subr.bf16.mxu0 %v2900_v41  ;;  %v2984_v34 = vld [vmem:[%s3240_s10 + $0x324] ss:$16 sps:$4 sm:$0xff]   ;;  %v2982_v36 = vld [vmem:[%s3240_s10 + $0x320] ss:$16 sps:$4 sm:$0xff]  }
  0x3e   : > { %1790 = vmatpush1.bf16.msra.mxu1 %v2931_v3  ;;  %v2987_v37 = vld [vmem:[%s3240_s10 + $0x144] ss:$16 sps:$4 sm:$0xff]   ;;  %v2985_v39 = vld [vmem:[%s3240_s10 + $0x140] ss:$16 sps:$4 sm:$0xff]  }
  0x3f   : > { %828 = vmatmul.mubr.bf16.gmra.mrb[4].mxu0 %v2899_v40  ;;  %1791 = vmatprep.subr.bf16.mxu1 %v2939_v5  ;;  %v2990_v38 = vld [vmem:[%s3240_s10 + $0x344] ss:$16 sps:$4 sm:$0xff]   ;;  %v2988_v40 = vld [vmem:[%s3240_s10 + $0x340] ss:$16 sps:$4 sm:$0xff]  }
  0x40   : > { %835 = vmatprep.mubr.bf16.mxu0 %v2905_v45  ;;  %2801 = vmatpush3.bf16.msra.mxu0 %v2900_v41  ;;  %v2993_v41 = vld [vmem:[%s3240_s10 + $0x164] ss:$16 sps:$4 sm:$0xff]  }
  0x41   : > { %893 = vmatmul.mubr.bf16.gmra.mrb[4].mxu1 %v2903_v43  ;;  %2802 = vmatprep.subr.bf16.mxu0 %v2904_v44  ;;  %v2996_v42 = vld [vmem:[%s3240_s10 + $0x364] ss:$16 sps:$4 sm:$0xff]   ;;  %v2991_v43 = vld [vmem:[%s3240_s10 + $0x160] ss:$16 sps:$4 sm:$0xff]  }
  0x42   : > { %900 = vmatprep.mubr.bf16.mxu1 %v2909_v46  ;;  %1792 = vmatpush1.bf16.msra.mxu1 %v2937_v7  ;;  %v2999_v45 = vld [vmem:[%s3240_s10 + $0x184] ss:$16 sps:$4 sm:$0xff]  }
  0x43   : > { %1793 = vmatprep.subr.bf16.mxu1 %v2945_v9  ;;  %v3002_v46 = vld [vmem:[%s3240_s10 + $0x384] ss:$16 sps:$4 sm:$0xff]  }
  0x44   : > { %2803 = vmatpush3.bf16.msra.mxu0 %v2904_v44  ;;  %v2994_v44 = vld [vmem:[%s3240_s10 + $0x360] ss:$16 sps:$4 sm:$0xff]  }
  0x45   : > { %2804 = vmatprep.subr.bf16.mxu0 %v2908_v47 }
  0x46   : > { %1794 = vmatpush1.bf16.msra.mxu1 %v2943_v11 }
  0x47   : > { %836 = vmatmul.mubr.bf16.gmra.mrb[8].mxu0 %v2907_v48  ;;  %1795 = vmatprep.subr.bf16.mxu1 %v2951_v13  ;;  %v3000_v48 = vld [vmem:[%s3240_s10 + $0x380] ss:$16 sps:$4 sm:$0xff]  }
  0x48   : > { %843 = vmatprep.mubr.bf16.mxu0 %v2913_v49  ;;  %2805 = vmatpush3.bf16.msra.mxu0 %v2908_v47  ;;  %v2997_v47 = vld [vmem:[%s3240_s10 + $0x180] ss:$16 sps:$4 sm:$0xff]   ;;  %v3005_v49 = vld [vmem:[%s3240_s10 + $0x1a4] ss:$16 sps:$4 sm:$0xff]  }
  0x49   : > { %901 = vmatmul.mubr.bf16.gmra.mrb[8].mxu1 %v2911_v50  ;;  %2806 = vmatprep.subr.bf16.mxu0 %v2912_v51  ;;  %v3008_v50 = vld [vmem:[%s3240_s10 + $0x3a4] ss:$16 sps:$4 sm:$0xff]  }
  0x4a   : > { %908 = vmatprep.mubr.bf16.mxu1 %v2917_v52  ;;  %1796 = vmatpush1.bf16.msra.mxu1 %v2949_v15  ;;  %v3006_v52 = vld [vmem:[%s3240_s10 + $0x3a0] ss:$16 sps:$4 sm:$0xff]  }
  0x4b   : > { %1797 = vmatprep.subr.bf16.mxu1 %v2957_v17 }
  0x4c   : > { %2807 = vmatpush3.bf16.msra.mxu0 %v2912_v51  ;;  %v3003_v51 = vld [vmem:[%s3240_s10 + $0x1a0] ss:$16 sps:$4 sm:$0xff]  }
  0x4d   : > { %2808 = vmatprep.subr.bf16.mxu0 %v2916_v54 }
  0x4e   : > { %1798 = vmatpush1.bf16.msra.mxu1 %v2955_v19 }
  0x4f   : > { %844 = vmatmul.mubr.bf16.gmra.mrb[12].mxu0 %v2915_v53  ;;  %1799 = vmatprep.subr.bf16.mxu1 %v2963_v21 }
  0x50   : > { %2812 = vmatprep.mubr.bf16.mxu0 %v2921_v55  ;;  %2809 = vmatpush3.bf16.msra.mxu0 %v2916_v54  ;;  %v2433_v54 = vld [vmem:[%s3648_s2] ss:$0 sm:$0xff] }
  0x51   : > { %909 = vmatmul.mubr.bf16.gmra.mrb[12].mxu1 %v2919_v56  ;;  %2810 = vmatprep.subr.bf16.mxu0 %v2920_v57 }
  0x52   : > { %1800 = vmatpush1.bf16.msra.mxu1 %v2961_v23 }
  0x53   : > { %1801 = vmatprep.subr.bf16.mxu1 %v2969_v25 }
  0x54   : > { %2811 = vmatpush3.bf16.msra.mxu0 %v2920_v57 }
  0x55   : > { %1828 = vmatprep.subr.bf16.mxu0 %v2930_v0 }
  0x56   : > { %1802 = vmatpush1.bf16.msra.mxu1 %v2967_v27 }
  0x57   : > { %2813 = vmatmul.mubr.bf16.vlgmr.msra.gmra.mrb[16].mxu0 %v2922_v58  ;;  %1803 = vmatprep.subr.bf16.mxu1 %v2975_v29 }
  0x58   : > { %2816 = vmatprep.mubr.bf16.mxu0 %v2923_v59  ;;  %1829 = vmatpush1.bf16.msra.mxu0 %v2928_v63 }
  0x59   : > { %1830 = vmatprep.subr.bf16.mxu0 %v2936_v2 }
  0x5a   : > { %1804 = vmatpush1.bf16.msra.mxu1 %v2973_v31 }
  0x5b   : > { %1805 = vmatprep.subr.bf16.mxu1 %v2981_v33 }
  0x5c   : > { %1831 = vmatpush1.bf16.msra.mxu0 %v2934_v4 }
  0x5d   : > { %1832 = vmatprep.subr.bf16.mxu0 %v2942_v6 }
  0x5e   : > { %1806 = vmatpush1.bf16.msra.mxu1 %v2979_v35 }
  0x5f   : > { %2817 = vmatmul.mubr.bf16.gmra.mrb[20].mxu0 %v2924_v60  ;;  %1807 = vmatprep.subr.bf16.mxu1 %v2987_v37 }
  0x60   : > { %1833 = vmatpush1.bf16.msra.mxu0 %v2940_v8 }
  0x61   : > { %1834 = vmatprep.subr.bf16.mxu0 %v2948_v10 }
  0x62   : > { %1808 = vmatpush1.bf16.msra.mxu1 %v2985_v39 }
  0x63   : > { %1809 = vmatprep.subr.bf16.mxu1 %v2993_v41 }
  0x64   : > { %1835 = vmatpush1.bf16.msra.mxu0 %v2946_v12 }
  0x65   : > { %1836 = vmatprep.subr.bf16.mxu0 %v2954_v14 }
  0x66   : > { %1810 = vmatpush1.bf16.msra.mxu1 %v2991_v43 }
  0x67   : > { %1811 = vmatprep.subr.bf16.mxu1 %v2999_v45 }
  0x68   : > { %1837 = vmatpush1.bf16.msra.mxu0 %v2952_v16 }
  0x69   : > { %1838 = vmatprep.subr.bf16.mxu0 %v2960_v18 }
  0x6a   : > { %1812 = vmatpush1.bf16.msra.mxu1 %v2997_v47 }
  0x6b   : > { %1813 = vmatprep.subr.bf16.mxu1 %v3005_v49 }
  0x6c   : > { %1839 = vmatpush1.bf16.msra.mxu0 %v2958_v20 }
  0x6d   : > { %1840 = vmatprep.subr.bf16.mxu0 %v2966_v22 }
  0x6e   : > { %1814 = vmatpush1.bf16.msra.mxu1 %v3003_v51 }
  0x70   : > { %1841 = vmatpush1.bf16.msra.mxu0 %v2964_v24 }
  0x71   : > { %1842 = vmatprep.subr.bf16.mxu0 %v2972_v26 }
  0x74   : > { %1843 = vmatpush1.bf16.msra.mxu0 %v2970_v28 }
  0x75   : > { %1844 = vmatprep.subr.bf16.mxu0 %v2978_v30 }
  0x78   : > { %1845 = vmatpush1.bf16.msra.mxu0 %v2976_v32 }
  0x79   : > { %1846 = vmatprep.subr.bf16.mxu0 %v2984_v34 }
  0x7c   : > { %1847 = vmatpush1.bf16.msra.mxu0 %v2982_v36 }
  0x7d   : > { %1848 = vmatprep.subr.bf16.mxu0 %v2990_v38 }
  0x80   : > { %1849 = vmatpush1.bf16.msra.mxu0 %v2988_v40 }
  0x81   : > { %1850 = vmatprep.subr.bf16.mxu0 %v2996_v42 }
  0x84   : > { %1851 = vmatpush1.bf16.msra.mxu0 %v2994_v44 }
  0x85   : > { %1852 = vmatprep.subr.bf16.mxu0 %v3002_v46 }
  0x88   : > { %1853 = vmatpush1.bf16.msra.mxu0 %v3000_v48 }
  0x89   : > { %1854 = vmatprep.subr.bf16.mxu0 %v3008_v50 }
  0x8c   : > { %1855 = vmatpush1.bf16.msra.mxu0 %v3006_v52 }
 0x10a   : > { %v2676_v53 = vpop.f32.mrb[0].mxu0 }
 0x10b   : > { %v2677_v55 = vpop.f32.mrb[1].mxu0 }
 0x10c   : > { %v2678_v56 = vadd.f32 %v2677_v55, %v2676_v53  ;;  %v2679_v57 = vpop.f32.mrb[2].mxu0  ;;  %v2716_v58 = vpop.f32.mrb[0].mxu1 }
 0x10d   : > { %v2680_v59 = vpop.f32.mrb[3].mxu0  ;;  %v2717_v62 = vpop.f32.mrb[1].mxu1 }
 0x10e   : > { %v822_v60 = vadd.f32 %v2678_v56, %v2433_v54  ;;  %v2681_v61 = vadd.f32 %v2680_v59, %v2679_v57  ;;  %v2718_v63 = vadd.f32 %v2717_v62, %v2716_v58  ;;  %v2719_v0 = vpop.f32.mrb[2].mxu1 }
 0x10f   : > { %v2720_v2 = vpop.f32.mrb[3].mxu1 }
 0x110   : > { %v825_v1 = vadd.f32 %v2681_v61, %v2433_v54  ;;  %v2721_v3 = vadd.f32 %v2720_v2, %v2719_v0  ;;  %v887_v4 = vadd.f32 %v2718_v63, %v822_v60  ;;  %v3011_v60 = vld [vmem:[%s3240_s10 + $0x1c4] ss:$16 sps:$4 sm:$0xff]   ;;  %v3009_v0 = vld [vmem:[%s3240_s10 + $0x1c0] ss:$16 sps:$4 sm:$0xff]  }
 0x111   : > { %v3014_v61 = vld [vmem:[%s3240_s10 + $0x3c4] ss:$16 sps:$4 sm:$0xff]   ;;  %1815 = vmatprep.subr.bf16.mxu1 %v3011_v60  ;;  %v3056_v60 = vld [vmem:[%s3240_s10 + $0x2ac] ss:$16 sps:$4 sm:$0xff]  }
 0x112   : > { %v2682_v5 = vpop.f32.mrb[4].mxu0  ;;  %v890_v7 = vadd.f32 %v2721_v3, %v825_v1  ;;  %v3012_v1 = vld [vmem:[%s3240_s10 + $0x3c0] ss:$16 sps:$4 sm:$0xff]   ;;  %1856 = vmatprep.subr.bf16.mxu0 %v3014_v61  ;;  %1816 = vmatpush1.bf16.msra.mxu1 %v3009_v0  ;;  %v3017_v2 = vld [vmem:[%s3240_s10 + $0x1e4] ss:$16 sps:$4 sm:$0xff]  }
 0x113   : > { %v2683_v6 = vpop.f32.mrb[5].mxu0  ;;  %1857 = vmatpush1.bf16.msra.mxu0 %v3012_v1  ;;  %v3020_v3 = vld [vmem:[%s3240_s10 + $0x3e4] ss:$16 sps:$4 sm:$0xff]   ;;  %1817 = vmatprep.subr.bf16.mxu1 %v3017_v2  ;;  %v3051_v61 = vld [vmem:[%s3240_s10 + $0xa8] ss:$16 sps:$4 sm:$0xff]  }
 0x114   : > { %v2684_v8 = vadd.f32 %v2683_v6, %v2682_v5  ;;  %v2685_v9 = vpop.f32.mrb[6].mxu0  ;;  %v2722_v10 = vpop.f32.mrb[4].mxu1  ;;  %v3015_v5 = vld [vmem:[%s3240_s10 + $0x1e0] ss:$16 sps:$4 sm:$0xff]   ;;  %1858 = vmatprep.subr.bf16.mxu0 %v3020_v3  ;;  %v3062_v0 = vld [vmem:[%s3240_s10 + $0x2cc] ss:$16 sps:$4 sm:$0xff]  }
 0x115   : > { %v2686_v11 = vpop.f32.mrb[7].mxu0  ;;  %v2723_v14 = vpop.f32.mrb[5].mxu1  ;;  %v3018_v6 = vld [vmem:[%s3240_s10 + $0x3e0] ss:$16 sps:$4 sm:$0xff]   ;;  %v3057_v1 = vld [vmem:[%s3240_s10 + $0xc8] ss:$16 sps:$4 sm:$0xff]  }
 0x116   : > { %v830_v12 = vadd.f32 %v2684_v8, %v2433_v54  ;;  %v2687_v13 = vadd.f32 %v2686_v11, %v2685_v9  ;;  %v2724_v15 = vadd.f32 %v2723_v14, %v2722_v10  ;;  %v2725_v16 = vpop.f32.mrb[6].mxu1  ;;  %1818 = vmatpush1.bf16.msra.mxu1 %v3015_v5  ;;  %v3065_v2 = vld [vmem:[%s3240_s10 + $0xec] ss:$16 sps:$4 sm:$0xff]   ;;  %v3063_v5 = vld [vmem:[%s3240_s10 + $0xe8] ss:$16 sps:$4 sm:$0xff]  }
 0x117   : > { %v2726_v18 = vpop.f32.mrb[7].mxu1  ;;  %1859 = vmatpush1.bf16.msra.mxu0 %v3018_v6  ;;  %v3068_v3 = vld [vmem:[%s3240_s10 + $0x2ec] ss:$16 sps:$4 sm:$0xff]   ;;  %v3066_v6 = vld [vmem:[%s3240_s10 + $0x2e8] ss:$16 sps:$4 sm:$0xff]  }
 0x118   : > { %v833_v17 = vadd.f32 %v2687_v13, %v2433_v54  ;;  %v2727_v19 = vadd.f32 %v2726_v18, %v2725_v16  ;;  %v895_v20 = vadd.f32 %v2724_v15, %v830_v12  ;;  %v3026_v12 = vld [vmem:[%s3240_s10 + $0x20c] ss:$16 sps:$4 sm:$0xff]  }
 0x119   : > { %1910 = vmatprep.subr.bf16.mxu0 %v3026_v12  ;;  %v3075_v12 = vld [vmem:[%s3240_s10 + $0x128] ss:$16 sps:$4 sm:$0xff]  }
 0x11a   : > { %v2688_v21 = vpop.f32.mrb[8].mxu0  ;;  %v898_v23 = vadd.f32 %v2727_v19, %v833_v17 }
 0x11b   : > { %v2689_v22 = vpop.f32.mrb[9].mxu0 }
 0x11c   : > { %v2690_v24 = vadd.f32 %v2689_v22, %v2688_v21  ;;  %v2691_v25 = vpop.f32.mrb[10].mxu0  ;;  %v2728_v26 = vpop.f32.mrb[8].mxu1 }
 0x11d   : > { %v2692_v27 = vpop.f32.mrb[11].mxu0  ;;  %v2729_v30 = vpop.f32.mrb[9].mxu1 }
 0x11e   : > { %v838_v28 = vadd.f32 %v2690_v24, %v2433_v54  ;;  %v2693_v29 = vadd.f32 %v2692_v27, %v2691_v25  ;;  %v2730_v31 = vadd.f32 %v2729_v30, %v2728_v26  ;;  %v2731_v32 = vpop.f32.mrb[10].mxu1 }
 0x11f   : > { %v2732_v34 = vpop.f32.mrb[11].mxu1 }
 0x120   : > { %v841_v33 = vadd.f32 %v2693_v29, %v2433_v54  ;;  %v2733_v35 = vadd.f32 %v2732_v34, %v2731_v32  ;;  %v903_v36 = vadd.f32 %v2730_v31, %v838_v28 }
 0x122   : > { %v2694_v37 = vpop.f32.mrb[12].mxu0  ;;  %v906_v39 = vadd.f32 %v2733_v35, %v841_v33 }
 0x123   : > { %v2695_v38 = vpop.f32.mrb[13].mxu0 }
 0x124   : > { %v2696_v40 = vadd.f32 %v2695_v38, %v2694_v37  ;;  %v2697_v41 = vpop.f32.mrb[14].mxu0  ;;  %v2734_v42 = vpop.f32.mrb[12].mxu1  ;;  %v3021_v38 = vld [vmem:[%s3240_s10 + $0x8] ss:$16 sps:$4 sm:$0xff]  }
 0x125   : > { %v2698_v43 = vpop.f32.mrb[15].mxu0  ;;  %v2735_v46 = vpop.f32.mrb[13].mxu1 }
 0x126   : > { %v846_v44 = vadd.f32 %v2696_v40, %v2433_v54  ;;  %v2699_v45 = vadd.f32 %v2698_v43, %v2697_v41  ;;  %v2736_v47 = vadd.f32 %v2735_v46, %v2734_v42  ;;  %v2737_v48 = vpop.f32.mrb[14].mxu1  ;;  %v3029_v42 = vld [vmem:[%s3240_s10 + $0x2c] ss:$16 sps:$4 sm:$0xff]  }
 0x127   : > { %v2738_v50 = vpop.f32.mrb[15].mxu1  ;;  %v3032_v43 = vld [vmem:[%s3240_s10 + $0x22c] ss:$16 sps:$4 sm:$0xff]  }
 0x128   : > { %v849_v49 = vadd.f32 %v2699_v45, %v2433_v54  ;;  %v2739_v51 = vadd.f32 %v2738_v50, %v2737_v48  ;;  %v911_v52 = vadd.f32 %v2736_v47, %v846_v44  ;;  %v3027_v44 = vld [vmem:[%s3240_s10 + $0x28] ss:$16 sps:$4 sm:$0xff]   ;;  %v3035_v46 = vld [vmem:[%s3240_s10 + $0x4c] ss:$16 sps:$4 sm:$0xff]  }
 0x129   : > { %v3030_v45 = vld [vmem:[%s3240_s10 + $0x228] ss:$16 sps:$4 sm:$0xff]   ;;  %v3038_v47 = vld [vmem:[%s3240_s10 + $0x24c] ss:$16 sps:$4 sm:$0xff]  }
 0x12a   : > { %v2814_v53 = vpop.f32.mrb[16].mxu0  ;;  %v914_v55 = vadd.f32 %v2739_v51, %v849_v49  ;;  %v3033_v48 = vld [vmem:[%s3240_s10 + $0x48] ss:$16 sps:$4 sm:$0xff]   ;;  %v3041_v50 = vld [vmem:[%s3240_s10 + $0x6c] ss:$16 sps:$4 sm:$0xff]  }
 0x12b   : > { %v960_v56 = vadd.f32 %v2814_v53, %v895_v20  ;;  %v951_v57 = vpop.f32.mrb[17].mxu0  ;;  %v3036_v49 = vld [vmem:[%s3240_s10 + $0x248] ss:$16 sps:$4 sm:$0xff]   ;;  %v3044_v51 = vld [vmem:[%s3240_s10 + $0x26c] ss:$16 sps:$4 sm:$0xff]  }
 0x12c   : > { %v952_v58 = vadd.f32 %v951_v57, %v887_v4  ;;  %v2815_v59 = vpop.f32.mrb[18].mxu0  ;;  %v3042_v53 = vld [vmem:[%s3240_s10 + $0x268] ss:$16 sps:$4 sm:$0xff]  }
 0x12d   : > { %v963_v62 = vadd.f32 %v2815_v59, %v898_v23  ;;  %v954_v63 = vpop.f32.mrb[19].mxu0  ;;  %v984_v23 = vmax.f32 %v960_v56, 0.0  ;;  %v3050_v56 = vld [vmem:[%s3240_s10 + $0x28c] ss:$16 sps:$4 sm:$0xff]   ;;  %v3045_v57 = vld [vmem:[%s3240_s10 + $0x88] ss:$16 sps:$4 sm:$0xff]  }
 0x12e   : > { %v955_v54 = vadd.f32 %v954_v63, %v890_v7  ;;  %v3023_v7 = vld [vmem:[%s3240_s10 + $0xc] ss:$16 sps:$4 sm:$0xff]   ;;  %v982_v32 = vmax.f32 %v952_v58, 0.0  ;;  %v3048_v58 = vld [vmem:[%s3240_s10 + $0x288] ss:$16 sps:$4 sm:$0xff]  }
 0x12f   : > { %1869 = vmatprep.subr.bf16.mxu1 %v3023_v7  ;;  %v985_v16 = vmax.f32 %v963_v62, 0.0  ;;  %v3053_v59 = vld [vmem:[%s3240_s10 + $0xac] ss:$16 sps:$4 sm:$0xff]   ;;  %v3054_v62 = vld [vmem:[%s3240_s10 + $0x2a8] ss:$16 sps:$4 sm:$0xff]  }
 0x130   : > { %v983_v18 = vmax.f32 %v955_v54, 0.0  ;;  %v3059_v63 = vld [vmem:[%s3240_s10 + $0xcc] ss:$16 sps:$4 sm:$0xff]   ;;  %v3060_v54 = vld [vmem:[%s3240_s10 + $0x2c8] ss:$16 sps:$4 sm:$0xff]  }
 0x131   : > { %v3080_v7 = vld [vmem:[%s3240_s10 + $0x32c] ss:$16 sps:$4 sm:$0xff]  }
 0x132   : > { %v2818_v4 = vpop.f32.mrb[20].mxu0 }
 0x133   : > { %v976_v8 = vadd.f32 %v2818_v4, %v911_v52  ;;  %v967_v9 = vpop.f32.mrb[21].mxu0  ;;  %v3039_v52 = vld [vmem:[%s3240_s10 + $0x68] ss:$16 sps:$4 sm:$0xff]   ;;  %v3071_v4 = vld [vmem:[%s3240_s10 + $0x10c] ss:$16 sps:$4 sm:$0xff]  }
 0x134   : > { %v968_v10 = vadd.f32 %v967_v9, %v903_v36  ;;  %v2819_v11 = vpop.f32.mrb[22].mxu0  ;;  %v3069_v9 = vld [vmem:[%s3240_s10 + $0x108] ss:$16 sps:$4 sm:$0xff]  }
 0x135   : > { %v979_v13 = vadd.f32 %v2819_v11, %v914_v55  ;;  %v970_v14 = vpop.f32.mrb[23].mxu0  ;;  %v988_v24 = vmax.f32 %v976_v8, 0.0  ;;  %v3047_v55 = vld [vmem:[%s3240_s10 + $0x8c] ss:$16 sps:$4 sm:$0xff]  }
 0x136   : > { %v971_v15 = vadd.f32 %v970_v14, %v906_v39  ;;  %v986_v33 = vmax.f32 %v968_v10, 0.0  ;;  %v3024_v39 = vld [vmem:[%s3240_s10 + $0x208] ss:$16 sps:$4 sm:$0xff]   ;;  %v3074_v8 = vld [vmem:[%s3240_s10 + $0x30c] ss:$16 sps:$4 sm:$0xff]  }
 0x137   : > { %v989_v17 = vmax.f32 %v979_v13, 0.0  ;;  %v3072_v10 = vld [vmem:[%s3240_s10 + $0x308] ss:$16 sps:$4 sm:$0xff]   ;;  %v3077_v11 = vld [vmem:[%s3240_s10 + $0x12c] ss:$16 sps:$4 sm:$0xff]  }
 0x138   : > { %v987_v19 = vmax.f32 %v971_v15, 0.0  ;;  %v3078_v13 = vld [vmem:[%s3240_s10 + $0x328] ss:$16 sps:$4 sm:$0xff]   ;;  %v3083_v14 = vld [vmem:[%s3240_s10 + $0x14c] ss:$16 sps:$4 sm:$0xff]  }
 0x139   : > { %v2847_v20 = vpack.i.bf16 %v989_v17, %v985_v16  ;;  %v3086_v15 = vld [vmem:[%s3240_s10 + $0x34c] ss:$16 sps:$4 sm:$0xff]   ;;  %v3081_v16 = vld [vmem:[%s3240_s10 + $0x148] ss:$16 sps:$4 sm:$0xff]  }
 0x13a   : > { %v2852_v21 = vpack.i.bf16 %v987_v19, %v983_v18  ;;  %v3084_v17 = vld [vmem:[%s3240_s10 + $0x348] ss:$16 sps:$4 sm:$0xff]   ;;  %v3089_v18 = vld [vmem:[%s3240_s10 + $0x16c] ss:$16 sps:$4 sm:$0xff]  }
 0x13b   : > { %2848 = vrot.lane.b32.xlu0 %v2847_v20, %s3174_s8  ;;  %v3092_v19 = vld [vmem:[%s3240_s10 + $0x36c] ss:$16 sps:$4 sm:$0xff]   ;;  %v3087_v20 = vld [vmem:[%s3240_s10 + $0x168] ss:$16 sps:$4 sm:$0xff]  }
 0x13f   : > { %2853 = vrot.lane.b32.xlu0 %v2852_v21, %s3174_s8  ;;  %v3090_v21 = vld [vmem:[%s3240_s10 + $0x368] ss:$16 sps:$4 sm:$0xff]  }
 0x1ad   : > { %v2849_v22 = vpop.permute.xlu0 %2848 }
 0x1ae   : > { %v2851_v25 = vunpack.i.h.bf16 %v2849_v22  ;;  %v2850_v26 = vunpack.i.l.bf16 %v2849_v22  ;;  %v3095_v22 = vld [vmem:[%s3240_s10 + $0x18c] ss:$16 sps:$4 sm:$0xff]  }
 0x1b0   : > { %v1008_v27 = vsel %vm1006_vm0, %v984_v23, %v2850_v26  ;;  %v1010_v28 = vsel %vm1006_vm0, %v988_v24, %v2851_v25  ;;  %v3098_v23 = vld [vmem:[%s3240_s10 + $0x38c] ss:$16 sps:$4 sm:$0xff]   ;;  %v3093_v24 = vld [vmem:[%s3240_s10 + $0x188] ss:$16 sps:$4 sm:$0xff]  }
 0x1b1   : > { %v2854_v29 = vpop.permute.xlu0 %2853  ;;  %v1016_v30 = vpack.c.bf16 %v1008_v27, %v1008_v27  ;;  %v1018_v31 = vpack.c.bf16 %v1010_v28, %v1010_v28  ;;  %v3096_v25 = vld [vmem:[%s3240_s10 + $0x388] ss:$16 sps:$4 sm:$0xff]   ;;  %v3101_v26 = vld [vmem:[%s3240_s10 + $0x1ac] ss:$16 sps:$4 sm:$0xff]  }
 0x1b2   : > { %v2856_v34 = vunpack.i.h.bf16 %v2854_v29  ;;  %v2855_v35 = vunpack.i.l.bf16 %v2854_v29  ;;  %v3104_v27 = vld [vmem:[%s3240_s10 + $0x3ac] ss:$16 sps:$4 sm:$0xff]   ;;  %v3099_v28 = vld [vmem:[%s3240_s10 + $0x1a8] ss:$16 sps:$4 sm:$0xff]  }
 0x1b3   : > { %1819 = vmatprep.mubr.bf16.mxu1 %v1016_v30  ;;  %1860 = vmatprep.mubr.bf16.mxu0 %v1018_v31  ;;  %v3102_v29 = vld [vmem:[%s3240_s10 + $0x3a8] ss:$16 sps:$4 sm:$0xff]  }
 0x1b4   : > { %v1009_v36 = vsel %vm1006_vm0, %v986_v33, %v2856_v34  ;;  %v1007_v37 = vsel %vm1006_vm0, %v982_v32, %v2855_v35  ;;  %v3105_v32 = vld [vmem:[%s3240_s10 + $0x1c8] ss:$16 sps:$4 sm:$0xff]   ;;  %v3113_v34 = vld [vmem:[%s3240_s10 + $0x1ec] ss:$16 sps:$4 sm:$0xff]  }
 0x1b5   : > { %v3463_v40 = vpack.c.bf16 %v1009_v36, %v1009_v36  ;;  %v3465_v41 = vpack.c.bf16 %v1007_v37, %v1007_v37  ;;  %v3108_v33 = vld [vmem:[%s3240_s10 + $0x3c8] ss:$16 sps:$4 sm:$0xff]   ;;  %v3116_v35 = vld [vmem:[%s3240_s10 + $0x3ec] ss:$16 sps:$4 sm:$0xff]  }
 0x1b6   : > { %v3111_v36 = vld [vmem:[%s3240_s10 + $0x1e8] ss:$16 sps:$4 sm:$0xff]  }
 0x1b7   : > { %1820 = vmatmul.mubr.bf16.vlgmr.msra.gmra.mrb[16].mxu1 %v3465_v41  ;;  %1861 = vmatmul.mubr.bf16.vlgmr.msra.gmra.mrb[24].mxu0 %v3463_v40  ;;  %v3114_v37 = vld [vmem:[%s3240_s10 + $0x3e8] ss:$16 sps:$4 sm:$0xff]  }
 0x1b8   : > { %1870 = vmatpush1.bf16.msra.mxu1 %v3021_v38  ;;  %1911 = vmatpush1.bf16.msra.mxu0 %v3024_v39  ;;  %v1011_v39 = vld [vmem:[#allocation2] sm:$0xff] }
 0x1b9   : > { %1901 = vmatprep.mubr.bf16.mxu1 %v1016_v30  ;;  %1942 = vmatprep.mubr.bf16.mxu0 %v1018_v31  ;;  %v3107_v30 = vld [vmem:[%s3240_s10 + $0x1cc] ss:$16 sps:$4 sm:$0xff]  }
 0x1ba   : > { %1871 = vmatprep.subr.bf16.mxu1 %v3029_v42  ;;  %1912 = vmatprep.subr.bf16.mxu0 %v3032_v43  ;;  %v3110_v31 = vld [vmem:[%s3240_s10 + $0x3cc] ss:$16 sps:$4 sm:$0xff]  }
 0x1bc   : > { %1872 = vmatpush1.bf16.msra.mxu1 %v3027_v44  ;;  %1913 = vmatpush1.bf16.msra.mxu0 %v3030_v45  ;;  %v1012_v45 = vld [vmem:[#allocation2 + $0x8] sm:$0xff] }
 0x1bd   : > { %1873 = vmatprep.subr.bf16.mxu1 %v3035_v46  ;;  %1914 = vmatprep.subr.bf16.mxu0 %v3038_v47 }
 0x1c0   : > { %1874 = vmatpush1.bf16.msra.mxu1 %v3033_v48  ;;  %1915 = vmatpush1.bf16.msra.mxu0 %v3036_v49 }
 0x1c1   : > { %1875 = vmatprep.subr.bf16.mxu1 %v3041_v50  ;;  %1916 = vmatprep.subr.bf16.mxu0 %v3044_v51 }
 0x1c4   : > { %1876 = vmatpush1.bf16.msra.mxu1 %v3039_v52  ;;  %1917 = vmatpush1.bf16.msra.mxu0 %v3042_v53 }
 0x1c5   : > { %1877 = vmatprep.subr.bf16.mxu1 %v3047_v55  ;;  %1918 = vmatprep.subr.bf16.mxu0 %v3050_v56 }
 0x1c8   : > { %1878 = vmatpush1.bf16.msra.mxu1 %v3045_v57  ;;  %1919 = vmatpush1.bf16.msra.mxu0 %v3048_v58  ;;  %v1014_v58 = vld [vmem:[#allocation2 + $0x18] sm:$0xff] }
 0x1c9   : > { %1879 = vmatprep.subr.bf16.mxu1 %v3053_v59  ;;  %1920 = vmatprep.subr.bf16.mxu0 %v3056_v60 }
 0x1cc   : > { %1880 = vmatpush1.bf16.msra.mxu1 %v3051_v61  ;;  %1921 = vmatpush1.bf16.msra.mxu0 %v3054_v62 }
 0x1cd   : > { %1881 = vmatprep.subr.bf16.mxu1 %v3059_v63  ;;  %1922 = vmatprep.subr.bf16.mxu0 %v3062_v0 }
 0x1d0   : > { %1882 = vmatpush1.bf16.msra.mxu1 %v3057_v1  ;;  %1923 = vmatpush1.bf16.msra.mxu0 %v3060_v54 }
 0x1d1   : > { %1883 = vmatprep.subr.bf16.mxu1 %v3065_v2  ;;  %1924 = vmatprep.subr.bf16.mxu0 %v3068_v3  ;;  %v3117_v2 = vld [vmem:[%s3651_s5 + $0x40] sm:$0xff] (!%p2622_p6)  }
 0x1d2   : > { %v3118_v3 = vld [vmem:[%s3651_s5 + $0xc0] sm:$0xff] (!%p2622_p6)  }
 0x1d4   : > { %1884 = vmatpush1.bf16.msra.mxu1 %v3063_v5  ;;  %1925 = vmatpush1.bf16.msra.mxu0 %v3066_v6  ;;  %v3119_v5 = vld [vmem:[%s3651_s5] sm:$0xff] (!%p2622_p6)  }
 0x1d5   : > { %1885 = vmatprep.subr.bf16.mxu1 %v3071_v4  ;;  %1926 = vmatprep.subr.bf16.mxu0 %v3074_v8  ;;  %v3120_v6 = vld [vmem:[%s3651_s5 + $0x80] sm:$0xff] (!%p2622_p6)   ;;  %v3121_v4 = vld [vmem:[%s3651_s5 + $0x48] sm:$0xff] (!%p2622_p6)  }
 0x1d6   : > { %v3122_v8 = vld [vmem:[%s3651_s5 + $0xc8] sm:$0xff] (!%p2622_p6)  }
 0x1d8   : > { %1886 = vmatpush1.bf16.msra.mxu1 %v3069_v9  ;;  %1927 = vmatpush1.bf16.msra.mxu0 %v3072_v10  ;;  %v3123_v9 = vld [vmem:[%s3651_s5 + $0x8] sm:$0xff] (!%p2622_p6)  }
 0x1d9   : > { %1887 = vmatprep.subr.bf16.mxu1 %v3077_v11  ;;  %1928 = vmatprep.subr.bf16.mxu0 %v3080_v7  ;;  %v3124_v10 = vld [vmem:[%s3651_s5 + $0x88] sm:$0xff] (!%p2622_p6)   ;;  %v3125_v11 = vld [vmem:[%s3651_s5 + $0x50] sm:$0xff] (!%p2622_p6)  }
 0x1da   : > { %v3126_v7 = vld [vmem:[%s3651_s5 + $0xd0] sm:$0xff] (!%p2622_p6)  }
 0x1dc   : > { %1888 = vmatpush1.bf16.msra.mxu1 %v3075_v12  ;;  %1929 = vmatpush1.bf16.msra.mxu0 %v3078_v13  ;;  %v3127_v12 = vld [vmem:[%s3651_s5 + $0x10] sm:$0xff] (!%p2622_p6)  }
 0x1dd   : > { %1889 = vmatprep.subr.bf16.mxu1 %v3083_v14  ;;  %1930 = vmatprep.subr.bf16.mxu0 %v3086_v15  ;;  %v3128_v13 = vld [vmem:[%s3651_s5 + $0x90] sm:$0xff] (!%p2622_p6)   ;;  %v3129_v14 = vld [vmem:[%s3651_s5 + $0x58] sm:$0xff] (!%p2622_p6)  }
 0x1de   : > { %v3130_v15 = vld [vmem:[%s3651_s5 + $0xd8] sm:$0xff] (!%p2622_p6)  }
 0x1e0   : > { %1890 = vmatpush1.bf16.msra.mxu1 %v3081_v16  ;;  %1931 = vmatpush1.bf16.msra.mxu0 %v3084_v17  ;;  %v3131_v16 = vld [vmem:[%s3651_s5 + $0x18] sm:$0xff] (!%p2622_p6)  }
 0x1e1   : > { %1891 = vmatprep.subr.bf16.mxu1 %v3089_v18  ;;  %1932 = vmatprep.subr.bf16.mxu0 %v3092_v19  ;;  %v3132_v17 = vld [vmem:[%s3651_s5 + $0x98] sm:$0xff] (!%p2622_p6)   ;;  %v3133_v18 = vld [vmem:[%s3651_s5 + $0x60] sm:$0xff] (!%p2622_p6)  }
 0x1e2   : > { %v3134_v19 = vld [vmem:[%s3651_s5 + $0xe0] sm:$0xff] (!%p2622_p6)  }
 0x1e4   : > { %1892 = vmatpush1.bf16.msra.mxu1 %v3087_v20  ;;  %1933 = vmatpush1.bf16.msra.mxu0 %v3090_v21  ;;  %v3135_v20 = vld [vmem:[%s3651_s5 + $0x20] sm:$0xff] (!%p2622_p6)   ;;  %v1969_v21 = vlaneseq (!%p2622_p6) }
 0x1e5   : > { %1893 = vmatprep.subr.bf16.mxu1 %v3095_v22  ;;  %1934 = vmatprep.subr.bf16.mxu0 %v3098_v23  ;;  %v3136_v22 = vld [vmem:[%s3651_s5 + $0xa0] sm:$0xff] (!%p2622_p6)   ;;  %v3137_v23 = vld [vmem:[%s3651_s5 + $0x68] sm:$0xff] (!%p2622_p6)  }
 0x1e8   : > { %1894 = vmatpush1.bf16.msra.mxu1 %v3093_v24  ;;  %1935 = vmatpush1.bf16.msra.mxu0 %v3096_v25  ;;  %v3138_v24 = vld [vmem:[%s3651_s5 + $0xe8] sm:$0xff] (!%p2622_p6)  }
 0x1e9   : > { %1895 = vmatprep.subr.bf16.mxu1 %v3101_v26  ;;  %1936 = vmatprep.subr.bf16.mxu0 %v3104_v27  ;;  %v3139_v25 = vld [vmem:[%s3651_s5 + $0x28] sm:$0xff] (!%p2622_p6)   ;;  %v1970_v26 = vshrl.u32 (!%p2622_p6), %v1969_v21, 7 }
 0x1ea   : > { %v3140_v27 = vld [vmem:[%s3651_s5 + $0xa8] sm:$0xff] (!%p2622_p6)  }
 0x1ec   : > { %1896 = vmatpush1.bf16.msra.mxu1 %v3099_v28  ;;  %1937 = vmatpush1.bf16.msra.mxu0 %v3102_v29  ;;  %v3141_v28 = vld [vmem:[%s3651_s5 + $0x70] sm:$0xff] (!%p2622_p6)  }
 0x1ed   : > { %1897 = vmatprep.subr.bf16.mxu1 %v3107_v30  ;;  %1938 = vmatprep.subr.bf16.mxu0 %v3110_v31  ;;  %v3142_v29 = vld [vmem:[%s3651_s5 + $0xf0] sm:$0xff] (!%p2622_p6)   ;;  %v1975_v31 = vsub.s32 (!%p2622_p6), 1, %v1970_v26 }
 0x1ee   : > { %v3143_v30 = vld [vmem:[%s3651_s5 + $0x30] sm:$0xff] (!%p2622_p6)  }
 0x1f0   : > { %1898 = vmatpush1.bf16.msra.mxu1 %v3105_v32  ;;  %1939 = vmatpush1.bf16.msra.mxu0 %v3108_v33  ;;  %v3144_v32 = vld [vmem:[%s3651_s5 + $0xb0] sm:$0xff] (!%p2622_p6)   ;;  %v1983_v33 = vsub.s32 (!%p2622_p6), 3, %v1970_v26 }
 0x1f1   : > { %1899 = vmatprep.subr.bf16.mxu1 %v3113_v34  ;;  %1940 = vmatprep.subr.bf16.mxu0 %v3116_v35  ;;  %v3145_v34 = vld [vmem:[%s3651_s5 + $0x78] sm:$0xff] (!%p2622_p6)   ;;  %v1971_v35 = vsub.s32 (!%p2622_p6), 0, %v1970_v26 }
 0x1f4   : > { %1900 = vmatpush1.bf16.msra.mxu1 %v3111_v36  ;;  %1941 = vmatpush1.bf16.msra.mxu0 %v3114_v37  ;;  %v3146_v36 = vld [vmem:[%s3651_s5 + $0xf8] sm:$0xff] (!%p2622_p6)   ;;  %v1979_v37 = vsub.s32 (!%p2622_p6), 2, %v1970_v26 }
 0x1f5   : > { %2752 = vmatprep.subr.bf16.mxu0 (!%p2622_p6), %v3117_v2  ;;  %2774 = vmatprep.subr.bf16.mxu1 (!%p2622_p6), %v3118_v3 }
 0x1f7   : > { %1902 = vmatmul.mubr.bf16.vlgmr.msra.gmra.mrb[20].mxu1 %v3465_v41  ;;  %1943 = vmatmul.mubr.bf16.vlgmr.msra.gmra.mrb[28].mxu0 %v3463_v40  ;;  %v1013_v41 = vld [vmem:[#allocation2 + $0x10] sm:$0xff] }
 0x1f8   : > { %2753 = vmatpush3.bf16.msra.mxu0 (!%p2622_p6), %v3119_v5  ;;  %2775 = vmatpush3.bf16.msra.mxu1 (!%p2622_p6), %v3120_v6 }
 0x1f9   : > { %2754 = vmatprep.subr.bf16.mxu0 (!%p2622_p6), %v3121_v4  ;;  %2776 = vmatprep.subr.bf16.mxu1 (!%p2622_p6), %v3122_v8 }
 0x1fc   : > { %2755 = vmatpush3.bf16.msra.mxu0 (!%p2622_p6), %v3123_v9  ;;  %2777 = vmatpush3.bf16.msra.mxu1 (!%p2622_p6), %v3124_v10 }
 0x1fd   : > { %2756 = vmatprep.subr.bf16.mxu0 (!%p2622_p6), %v3125_v11  ;;  %2778 = vmatprep.subr.bf16.mxu1 (!%p2622_p6), %v3126_v7 }
 0x200   : > { %2757 = vmatpush3.bf16.msra.mxu0 (!%p2622_p6), %v3127_v12  ;;  %2779 = vmatpush3.bf16.msra.mxu1 (!%p2622_p6), %v3128_v13 }
 0x201   : > { %2758 = vmatprep.subr.bf16.mxu0 (!%p2622_p6), %v3129_v14  ;;  %2780 = vmatprep.subr.bf16.mxu1 (!%p2622_p6), %v3130_v15 }
 0x204   : > { %2759 = vmatpush3.bf16.msra.mxu0 (!%p2622_p6), %v3131_v16  ;;  %2781 = vmatpush3.bf16.msra.mxu1 (!%p2622_p6), %v3132_v17 }
 0x205   : > { %2760 = vmatprep.subr.bf16.mxu0 (!%p2622_p6), %v3133_v18  ;;  %2782 = vmatprep.subr.bf16.mxu1 (!%p2622_p6), %v3134_v19 }
 0x208   : > { %2761 = vmatpush3.bf16.msra.mxu0 (!%p2622_p6), %v3135_v20  ;;  %2783 = vmatpush3.bf16.msra.mxu1 (!%p2622_p6), %v3136_v22 }
 0x209   : > { %2762 = vmatprep.subr.bf16.mxu0 (!%p2622_p6), %v3137_v23  ;;  %2784 = vmatprep.subr.bf16.mxu1 (!%p2622_p6), %v3138_v24 }
 0x20c   : > { %2763 = vmatpush3.bf16.msra.mxu0 (!%p2622_p6), %v3139_v25  ;;  %2785 = vmatpush3.bf16.msra.mxu1 (!%p2622_p6), %v3140_v27 }
 0x20d   : > { %2764 = vmatprep.subr.bf16.mxu0 (!%p2622_p6), %v3141_v28  ;;  %2786 = vmatprep.subr.bf16.mxu1 (!%p2622_p6), %v3142_v29 }
 0x210   : > { %2765 = vmatpush3.bf16.msra.mxu0 (!%p2622_p6), %v3143_v30  ;;  %2787 = vmatpush3.bf16.msra.mxu1 (!%p2622_p6), %v3144_v32 }
 0x211   : > { %2766 = vmatprep.subr.bf16.mxu0 (!%p2622_p6), %v3145_v34  ;;  %2788 = vmatprep.subr.bf16.mxu1 (!%p2622_p6), %v3146_v36 }
 0x28a   : > { %v1821_v38 = vpop.f32.mrb[16].mxu1  ;;  %v1862_v42 = vpop.f32.mrb[24].mxu0 }
 0x28b   : > { %v1863_v43 = vadd.f32 %v1862_v42, %v1821_v38  ;;  %v1823_v44 = vpop.f32.mrb[17].mxu1  ;;  %v1864_v46 = vpop.f32.mrb[25].mxu0  ;;  %v3147_v38 = vld [vmem:[%s3651_s5 + $0x38] sm:$0xff] (!%p2622_p6)  }
 0x28c   : > { %v1865_v47 = vadd.f32 %v1864_v46, %v1823_v44  ;;  %v1825_v48 = vpop.f32.mrb[18].mxu1  ;;  %v1866_v49 = vpop.f32.mrb[26].mxu0  ;;  %2767 = vmatpush3.bf16.msra.mxu0 (!%p2622_p6), %v3147_v38 }
 0x28d   : > { %v1951_v50 = vadd.f32 %v1863_v43, %v1011_v39  ;;  %v1826_v51 = vpop.f32.mrb[19].mxu1  ;;  %v1867_v52 = vpop.f32.mrb[27].mxu0  ;;  %v3148_v39 = vld [vmem:[%s3651_s5 + $0xb8] sm:$0xff] (!%p2622_p6)   ;;  %v1967_v43 = vld [vmem:[%s3650_s4] sm:$0xf] (!%p2622_p6) }
 0x28e   : > { %v1952_v53 = vadd.f32 %v1865_v47, %v1012_v45  ;;  %2789 = vmatpush3.bf16.msra.mxu1 (!%p2622_p6), %v3148_v39  ;;  %v1976_v45 = vrot.slane (!%p2622_p6), %v1967_v43, %v1975_v31  ;;  %v1984_v46 = vrot.slane (!%p2622_p6), %v1967_v43, %v1983_v33  ;;  %v1972_v48 = vrot.slane (!%p2622_p6), %v1967_v43, %v1971_v35 }
 0x28f   : > { %1955 = vst [vmem:[#allocation2] sm:$0xff] %v1951_v50  ;;  %v1980_v50 = vrot.slane (!%p2622_p6), %v1967_v43, %v1979_v37 }
 0x290   : > { %1956 = vst [vmem:[#allocation2 + $0x8] sm:$0xff] %v1952_v53 }
 0x296   : > { %v1963_v47 = vld [vmem:[#allocation2] sm:$0xff] (!%p2622_p6) }
 0x297   : > { %v1964_v42 = vld [vmem:[#allocation2 + $0x8] sm:$0xff] (!%p2622_p6)  ;;  %v1989_v53 = vadd.f32 (!%p2622_p6), %v1972_v48, %v1963_v47 }
 0x298   : > { %v1990_v51 = vadd.f32 (!%p2622_p6), %v1976_v45, %v1964_v42 }
 0x2ca   : > { %v1903_v55 = vpop.f32.mrb[20].mxu1  ;;  %v1944_v56 = vpop.f32.mrb[28].mxu0  ;;  %1962 = sbr.rel (%p2622_p6) target bundleno = 953 (0x3b9), region = 56 }
 0x2cb   : > { %v1945_v40 = vadd.f32 %v1944_v56, %v1903_v55  ;;  %v1905_v57 = vpop.f32.mrb[21].mxu1  ;;  %v1946_v59 = vpop.f32.mrb[29].mxu0 }
 0x2cc   : > { %v1947_v60 = vadd.f32 %v1946_v59, %v1905_v57  ;;  %v1907_v61 = vpop.f32.mrb[22].mxu1  ;;  %v1948_v62 = vpop.f32.mrb[30].mxu0 }
 0x2cd   : > { %v1953_v63 = vadd.f32 %v1945_v40, %v1013_v41  ;;  %v1908_v0 = vpop.f32.mrb[23].mxu1  ;;  %v1949_v1 = vpop.f32.mrb[31].mxu0  ;;  %v1994_v41 = vmax.f32 (!%p2622_p6), %v1990_v51, 0.0  ;;  %v1993_v40 = vmax.f32 (!%p2622_p6), %v1989_v53, 0.0 }
 0x2ce   : > { %v1954_v54 = vadd.f32 %v1947_v60, %v1014_v58  ;;  %v2623_v0 = vld [vmem:[%s3652_s6] ss:$0 sm:$0xff] (!%p2622_p6) }
 0x2cf   : > { %1957 = vst [vmem:[#allocation2 + $0x10] sm:$0xff] %v1953_v63  ;;  %v1998_v58 = vpack.c.bf16 (!%p2622_p6), %v1994_v41, %v1994_v41  ;;  %v1997_v60 = vpack.c.bf16 (!%p2622_p6), %v1993_v40, %v1993_v40 }
 0x2d0   : > { %1958 = vst [vmem:[#allocation2 + $0x18] sm:$0xff] %v1954_v54 }
 0x2d1   : > { %2296 = vmatprep.mubr.bf16.mxu0 %v1998_v58 }
 0x2d2   : > { %2297 = vmatmul.mubr.bf16.vlgmr.msra.gmra.mrb[0].mxu0 %v1997_v60 }
 0x2d6   : > { %v1965_v49 = vld [vmem:[#allocation2 + $0x10] sm:$0xff] }
 0x2d7   : > { %v1966_v44 = vld [vmem:[#allocation2 + $0x18] sm:$0xff]  ;;  %v1991_v55 = vadd.f32 %v1980_v50, %v1965_v49 }
 0x2d8   : > { %v1992_v52 = vadd.f32 %v1984_v46, %v1966_v44 }
 0x2d9   : > { %v1995_v57 = vmax.f32 %v1991_v55, 0.0 }
 0x2da   : > { %v1996_v56 = vmax.f32 %v1992_v52, 0.0 }
 0x2db   : > { %v1999_v61 = vpack.c.bf16 %v1995_v57, %v1995_v57 }
 0x2dc   : > { %v2000_v59 = vpack.c.bf16 %v1996_v56, %v1996_v56 }
 0x2de   : > { %2336 = vmatprep.mubr.bf16.mxu1 %v2000_v59 }
 0x2df   : > { %2337 = vmatmul.mubr.bf16.vlgmr.msra.gmra.mrb[0].mxu1 %v1999_v61 }
 0x3a5   : > { %v2768_v62 = vpop.f32.mrb[0].mxu0 }
 0x3a6   : > { %v2769_v1 = vpop.f32.mrb[1].mxu0 }
 0x3a7   : > { %v2770_v2 = vadd.f32 %v2769_v1, %v2768_v62  ;;  %v2771_v5 = vpop.f32.mrb[2].mxu0 }
 0x3a8   : > { %v2772_v4 = vpop.f32.mrb[3].mxu0 }
 0x3a9   : > { %v2299_v9 = vadd.f32 %v2770_v2, %v2623_v0 }
 0x3b2   : > { %v2790_v63 = vpop.f32.mrb[0].mxu1 }
 0x3b3   : > { %v2791_v54 = vpop.f32.mrb[1].mxu1 }
 0x3b4   : > { %v2792_v3 = vadd.f32 %v2791_v54, %v2790_v63  ;;  %v2793_v6 = vpop.f32.mrb[2].mxu1 }
 0x3b5   : > { %v2794_v8 = vpop.f32.mrb[3].mxu1 }
 0x3b6   : > { %v2339_v10 = vadd.f32 %v2792_v3, %v2299_v9 }
 0x3b8   : > { %2344 = vst [vmem:[%s3653_s7] sm:$0xff] %v2339_v10 }
 0x3b9 PF: > { %s17_s26 = sadd.s32 1, %s3171_s26   ;;  %s3654_s24 = smov %s3167_s25 }
 0x3ba   : > { %p14_p7 = scmp.ge.s32.totalorder %s17_s26, 4   ;;  %s3655_s25 = smov %s3657_s27 }
 0x3bc   :  { %16 = sbr.rel (!%p14_p7) target bundleno = 2 (0x2), region = 89 }

</bundles_post_ra>
